<compile_context>
chip_gen: v7x
topology: tpu7x:2x2x1
jax: 0.10.0
libtpu: 0.0.40
codegen_flags: <defaults>
</compile_context>

<pallas_src>
import math
from functools import partial

import jax
import jax.numpy as jnp
from jax.experimental import pallas as pl
from jax.experimental.pallas import tpu as pltpu


# ----------------------------------------------------------------------------
# In-kernel elementwise helpers (traced inside the Pallas body)
# ----------------------------------------------------------------------------

def _gelu_tanh(x):
    # tanh-approximate GELU; differs from nn.GELU's exact erf by ~1e-3/elem.
    # TODO(synk): switch to exact erf if bit-parity with PyTorch is required.
    c = math.sqrt(2.0 / math.pi)
    return 0.5 * x * (1.0 + jnp.tanh(c * (x + 0.044715 * x * x * x)))


def _layernorm(x, g, b, eps):
    mu = jnp.mean(x, axis=-1, keepdims=True)
    xc = x - mu
    var = jnp.mean(xc * xc, axis=-1, keepdims=True)
    return xc * jax.lax.rsqrt(var + eps) * g + b


# ----------------------------------------------------------------------------
# Fused whole-model kernel
# ----------------------------------------------------------------------------

def _bert_model_kernel(emb_ref,
                       ge_ref, be_ref,
                       wqkv_ref, bqkv_ref, wo_ref, bo_ref, g1_ref, b1_ref,
                       wi_ref, bi_ref, wf_ref, bf_ref, g2_ref, b2_ref,
                       wp_ref, bp_ref, wout_ref, bout_ref,
                       o_ref,
                       ctx_ref,                      # VMEM scratch [Bblk*S, H]
                       *, num_heads, eps):
    """Embedding-LN -> L transformer layers -> pooler -> out, all VMEM-resident."""
    Bblk, S, H = emb_ref.shape
    Dh = H // num_heads
    L = wqkv_ref.shape[0]
    R = Bblk * S

    # embedding LayerNorm on the flattened [rows, H] slab
    x = _layernorm(emb_ref[...].reshape(R, H), ge_ref[...], be_ref[...], eps)

    for l in range(L):                                 # static unroll over layers
        # fused QKV projection: one [R,H] x [H,3H] MXU GEMM
        # (1/sqrt(Dh) already folded into the Q columns of wqkv/bqkv)
        qkv = jnp.dot(x, wqkv_ref[l], preferred_element_type=jnp.float32) + bqkv_ref[l]

        # per-batch, per-head attention; heads are static lane slices of qkv,
        # contexts written in place into the VMEM scratch (no concatenate).
        for b in range(Bblk):
            r0 = b * S
            for h in range(num_heads):
                c0 = h * Dh
                qh = qkv[r0:r0 + S, c0:c0 + Dh]
                kh = qkv[r0:r0 + S, H + c0:H + c0 + Dh]
                vh = qkv[r0:r0 + S, 2 * H + c0:2 * H + c0 + Dh]
                s = jnp.dot(qh, kh.T, preferred_element_type=jnp.float32)   # [S,S]
                s = s - jnp.max(s, axis=-1, keepdims=True)
                p = jnp.exp(s)
                p = p * pl.reciprocal(jnp.sum(p, axis=-1, keepdims=True), approx=True)
                ctx_ref[r0:r0 + S, c0:c0 + Dh] = jnp.dot(
                    p, vh, preferred_element_type=jnp.float32)
        ctx = ctx_ref[...]                                                  # [R,H]

        # attention output projection + residual + LayerNorm
        attn_out = jnp.dot(ctx, wo_ref[l], preferred_element_type=jnp.float32) + bo_ref[l]
        x1 = _layernorm(x + attn_out, g1_ref[l], b1_ref[l], eps)

        # FFN (gelu) + residual + LayerNorm
        hdn = _gelu_tanh(jnp.dot(x1, wi_ref[l], preferred_element_type=jnp.float32)
                         + bi_ref[l])
        ffn = jnp.dot(hdn, wf_ref[l], preferred_element_type=jnp.float32) + bf_ref[l]
        x = _layernorm(x1 + ffn, g2_ref[l], b2_ref[l], eps)

    # pooled output: [CLS] row of each batch element -> tanh linear -> out linear
    cls = jnp.concatenate([x[b * S:b * S + 1, :] for b in range(Bblk)], axis=0)  # [Bblk,H]
    pooled = jnp.tanh(jnp.dot(cls, wp_ref[...], preferred_element_type=jnp.float32)
                      + bp_ref[...])
    logits = jnp.dot(pooled, wout_ref[...], preferred_element_type=jnp.float32) + bout_ref[...]
    o_ref[:, 0, :] = logits


# ----------------------------------------------------------------------------
# pallas_call wrapper
# ----------------------------------------------------------------------------

def _rep_spec(arr):
    # full-array block, same block for every grid step (weights / biases / LN params)
    nd = arr.ndim
    return pl.BlockSpec(arr.shape, lambda b, _nd=nd: (0,) * _nd)


def fused_bert_model(emb, p, *, num_heads, output_dim, batch_grid, eps=1e-12):
    """emb: [B, S, H] summed embeddings -> [B, output_dim] logits, one pallas_call."""
    B, S, H = emb.shape
    N = output_dim
    weights = [p["emb_ln_g"], p["emb_ln_b"],
               p["wqkv"], p["bqkv"], p["wo"], p["bo"], p["g1"], p["b1"],
               p["wi"], p["bi"], p["wf"], p["bf"], p["g2"], p["b2"],
               p["wp"], p["bp"], p["wout"], p["bout"]]
    kernel = partial(_bert_model_kernel, num_heads=num_heads, eps=eps)

    if batch_grid and B > 1:
        # v7x: one batch element per TensorCore via a 2-wide parallel grid.
        out = pl.pallas_call(
            kernel,
            out_shape=jax.ShapeDtypeStruct((B, 1, N), jnp.float32),
            grid=(B,),
            in_specs=[pl.BlockSpec((1, S, H), lambda b: (b, 0, 0))]
                     + [_rep_spec(w) for w in weights],
            out_specs=pl.BlockSpec((1, 1, N), lambda b: (b, 0, 0)),
            scratch_shapes=[pltpu.VMEM((S, H), jnp.float32)],
            compiler_params=pltpu.CompilerParams(dimension_semantics=("parallel",)),
        )(emb, *weights)
    else:
        # v5e / v6e (single TensorCore): one grid step, whole [B,S,H] block resident.
        vmem = pl.BlockSpec(memory_space=pltpu.MemorySpace.VMEM)
        out = pl.pallas_call(
            kernel,
            out_shape=jax.ShapeDtypeStruct((B, 1, N), jnp.float32),
            in_specs=[vmem] * (1 + len(weights)),
            out_specs=vmem,
            scratch_shapes=[pltpu.VMEM((B * S, H), jnp.float32)],
        )(emb, *weights)
    return out[:, 0, :]


# ----------------------------------------------------------------------------
# Synthetic BERT parameters (deterministic init) + one-time prep (stack + fold)
# ----------------------------------------------------------------------------

class Config:
    vocab_size = 100
    hidden_size = 32
    num_layers = 2
    num_heads = 2
    intermediate_size = 64
    max_position = 16
    type_vocab_size = 2
    output_dim = 3


def init_params(cfg, key):
    std = 0.02
    ks = iter(jax.random.split(key, 64))
    H, I = cfg.hidden_size, cfg.intermediate_size

    def dense(k, fan_in, fan_out):
        kw, kb = jax.random.split(k)
        return {"w": jax.random.normal(kw, (fan_in, fan_out), jnp.float32) * std,
                "b": jax.random.normal(kb, (1, fan_out), jnp.float32) * std}

    def ln(dim):
        return {"g": jnp.ones((1, dim), jnp.float32),
                "b": jnp.zeros((1, dim), jnp.float32)}

    params = {
        "word_emb": jax.random.normal(next(ks), (cfg.vocab_size, H), jnp.float32) * std,
        "pos_emb": jax.random.normal(next(ks), (cfg.max_position, H), jnp.float32) * std,
        "type_emb": jax.random.normal(next(ks), (cfg.type_vocab_size, H), jnp.float32) * std,
        "emb_ln": ln(H),
        "layers": [],
        "pooler": dense(next(ks), H, H),
        "out": dense(next(ks), H, cfg.output_dim),   # SimpleBERT.out
    }
    for _ in range(cfg.num_layers):
        params["layers"].append({
            "qkv": dense(next(ks), H, 3 * H),        # Q|K|V fused into one GEMM weight
            "attn_out": dense(next(ks), H, H),
            "attn_ln": ln(H),
            "ffn_in": dense(next(ks), H, I),
            "ffn_out": dense(next(ks), I, H),
            "ffn_ln": ln(H),
        })
    return params


def prepare_params(params, cfg):
    """Stack per-layer weights along a leading layer axis and fold the attention
    scale into the Q columns of wqkv/bqkv (done once, outside the forward)."""
    H = cfg.hidden_size
    Dh = H // cfg.num_heads
    scale = 1.0 / math.sqrt(Dh)

    def stack(fn):
        return jnp.stack([fn(l) for l in params["layers"]], axis=0)

    q_scale = jnp.concatenate([jnp.full((H,), scale, jnp.float32),
                               jnp.ones((2 * H,), jnp.float32)])
    wqkv = stack(lambda l: l["qkv"]["w"]) * q_scale[None, None, :]
    bqkv = stack(lambda l: l["qkv"]["b"]) * q_scale[None, None, :]

    return {
        "word_emb": params["word_emb"],
        "pos_emb": params["pos_emb"],
        "type_emb": params["type_emb"],
        "emb_ln_g": params["emb_ln"]["g"], "emb_ln_b": params["emb_ln"]["b"],
        "wqkv": wqkv, "bqkv": bqkv,
        "wo": stack(lambda l: l["attn_out"]["w"]), "bo": stack(lambda l: l["attn_out"]["b"]),
        "g1": stack(lambda l: l["attn_ln"]["g"]), "b1": stack(lambda l: l["attn_ln"]["b"]),
        "wi": stack(lambda l: l["ffn_in"]["w"]), "bi": stack(lambda l: l["ffn_in"]["b"]),
        "wf": stack(lambda l: l["ffn_out"]["w"]), "bf": stack(lambda l: l["ffn_out"]["b"]),
        "g2": stack(lambda l: l["ffn_ln"]["g"]), "b2": stack(lambda l: l["ffn_ln"]["b"]),
        "wp": params["pooler"]["w"], "bp": params["pooler"]["b"],
        "wout": params["out"]["w"], "bout": params["out"]["b"],
    }


# ----------------------------------------------------------------------------
# SimpleBERT forward:  output = Linear( bert(text)[1] )
# ----------------------------------------------------------------------------

def simple_bert_forward(prep, text, cfg, *, batch_grid):
    B, S = text.shape
    # embeddings: gathers in plain JAX (no clean Pallas equivalent on TPU);
    # everything downstream (emb LN -> layers -> pooler -> out) is one pallas_call.
    pos_ids = jnp.arange(S, dtype=jnp.int32)
    emb = (prep["word_emb"][text]
           + prep["pos_emb"][pos_ids][None, :, :]
           + prep["type_emb"][0][None, None, :])        # token_type_ids == 0
    return fused_bert_model(emb, prep,
                            num_heads=cfg.num_heads,
                            output_dim=cfg.output_dim,
                            batch_grid=batch_grid)


def _use_batch_grid():
    # v7x has 2 TensorCores per chip -> keep a parallel batch grid there;
    # single-TC v5e/v6e collapse to one grid step (less per-step overhead).
    try:
        kind = jax.devices()[0].device_kind.lower()
    except Exception:
        return True
    return "v7" in kind


# ----------------------------------------------------------------------------

if __name__ == "__main__":
    cfg = Config()
    key = jax.random.PRNGKey(0)
    k_params, k_text = jax.random.split(key)

    params = init_params(cfg, k_params)
    prep = prepare_params(params, cfg)          # one-time stack + scale fold
    text = jax.random.randint(k_text, (2, 8), 0, cfg.vocab_size, dtype=jnp.int32)

    fwd = jax.jit(partial(simple_bert_forward, cfg=cfg, batch_grid=_use_batch_grid()))
    out = fwd(prep, text)
    jax.block_until_ready(out)
    assert out.shape == (2, cfg.output_dim)
    print("KERNEL_OK")
</pallas_src>

<mosaic_0001>
module attributes {stable_mosaic.version = 11 : i64} {
  func.func @_bert_model_kernel(%arg0: memref<2x8x32xf32, #tpu.memory_space<vmem>>, %arg1: memref<1x32xf32, #tpu.memory_space<vmem>>, %arg2: memref<1x32xf32, #tpu.memory_space<vmem>>, %arg3: memref<2x32x96xf32, #tpu.memory_space<vmem>>, %arg4: memref<2x1x96xf32, #tpu.memory_space<vmem>>, %arg5: memref<2x32x32xf32, #tpu.memory_space<vmem>>, %arg6: memref<2x1x32xf32, #tpu.memory_space<vmem>>, %arg7: memref<2x1x32xf32, #tpu.memory_space<vmem>>, %arg8: memref<2x1x32xf32, #tpu.memory_space<vmem>>, %arg9: memref<2x32x64xf32, #tpu.memory_space<vmem>>, %arg10: memref<2x1x64xf32, #tpu.memory_space<vmem>>, %arg11: memref<2x64x32xf32, #tpu.memory_space<vmem>>, %arg12: memref<2x1x32xf32, #tpu.memory_space<vmem>>, %arg13: memref<2x1x32xf32, #tpu.memory_space<vmem>>, %arg14: memref<2x1x32xf32, #tpu.memory_space<vmem>>, %arg15: memref<32x32xf32, #tpu.memory_space<vmem>>, %arg16: memref<1x32xf32, #tpu.memory_space<vmem>>, %arg17: memref<32x3xf32, #tpu.memory_space<vmem>>, %arg18: memref<1x3xf32, #tpu.memory_space<vmem>>, %arg19: memref<2x1x3xf32, #tpu.memory_space<vmem>>, %arg20: memref<16x32xf32, #tpu.memory_space<vmem>>) attributes {dimension_semantics = [], scalar_prefetch = 0 : i64, scratch_operands = 1 : i64, tpu.core_type = #tpu.core_type<tc>} {
    %c0 = arith.constant 0 : index
    %c0_0 = arith.constant 0 : index
    %c0_1 = arith.constant 0 : index
    %0 = vector.load %arg0[%c0, %c0_0, %c0_1] : memref<2x8x32xf32, #tpu.memory_space<vmem>>, vector<2x8x32xf32>
    %1 = vector.shape_cast %0 : vector<2x8x32xf32> to vector<16x32xf32>
    %c0_2 = arith.constant 0 : index
    %c0_3 = arith.constant 0 : index
    %2 = vector.load %arg1[%c0_2, %c0_3] : memref<1x32xf32, #tpu.memory_space<vmem>>, vector<1x32xf32>
    %c0_4 = arith.constant 0 : index
    %c0_5 = arith.constant 0 : index
    %3 = vector.load %arg2[%c0_4, %c0_5] : memref<1x32xf32, #tpu.memory_space<vmem>>, vector<1x32xf32>
    %cst = arith.constant dense<0.000000e+00> : vector<16xf32>
    %4 = vector.multi_reduction <add>, %1, %cst [1] : vector<16x32xf32> to vector<16xf32>
    %5 = vector.shape_cast %4 : vector<16xf32> to vector<16x1xf32>
    %cst_6 = arith.constant 3.200000e+01 : f32
    %6 = vector.broadcast %cst_6 : f32 to vector<16x1xf32>
    %7 = arith.divf %5, %6 : vector<16x1xf32>
    %8 = vector.broadcast %7 : vector<16x1xf32> to vector<16x32xf32>
    %9 = arith.subf %1, %8 : vector<16x32xf32>
    %10 = arith.mulf %9, %9 : vector<16x32xf32>
    %cst_7 = arith.constant dense<0.000000e+00> : vector<16xf32>
    %11 = vector.multi_reduction <add>, %10, %cst_7 [1] : vector<16x32xf32> to vector<16xf32>
    %12 = vector.shape_cast %11 : vector<16xf32> to vector<16x1xf32>
    %cst_8 = arith.constant 3.200000e+01 : f32
    %13 = vector.broadcast %cst_8 : f32 to vector<16x1xf32>
    %14 = arith.divf %12, %13 : vector<16x1xf32>
    %cst_9 = arith.constant 9.99999996E-13 : f32
    %15 = vector.broadcast %cst_9 : f32 to vector<16x1xf32>
    %16 = arith.addf %14, %15 : vector<16x1xf32>
    %17 = math.rsqrt %16 : vector<16x1xf32>
    %18 = vector.broadcast %17 : vector<16x1xf32> to vector<16x32xf32>
    %19 = arith.mulf %9, %18 : vector<16x32xf32>
    %20 = vector.broadcast %2 : vector<1x32xf32> to vector<16x32xf32>
    %21 = arith.mulf %19, %20 : vector<16x32xf32>
    %22 = vector.broadcast %3 : vector<1x32xf32> to vector<16x32xf32>
    %23 = arith.addf %21, %22 : vector<16x32xf32>
    %c0_10 = arith.constant 0 : index
    %c0_11 = arith.constant 0 : index
    %c0_12 = arith.constant 0 : index
    %24 = vector.load %arg3[%c0_10, %c0_11, %c0_12] : memref<2x32x96xf32, #tpu.memory_space<vmem>>, vector<1x32x96xf32>
    %25 = vector.shape_cast %24 : vector<1x32x96xf32> to vector<32x96xf32>
    %cst_13 = arith.constant dense<0.000000e+00> : vector<16x96xf32>
    %26 = tpu.matmul %23, %25, %cst_13 {dimension_numbers = #tpu.dot_dimension_numbers<[1], [0], [0], [1], [0, 0, 1, 1], [], []>} : vector<16x32xf32>, vector<32x96xf32>, vector<16x96xf32> -> vector<16x96xf32>
    %c0_14 = arith.constant 0 : index
    %c0_15 = arith.constant 0 : index
    %c0_16 = arith.constant 0 : index
    %27 = vector.load %arg4[%c0_14, %c0_15, %c0_16] : memref<2x1x96xf32, #tpu.memory_space<vmem>>, vector<1x1x96xf32>
    %28 = vector.shape_cast %27 : vector<1x1x96xf32> to vector<1x96xf32>
    %29 = vector.broadcast %28 : vector<1x96xf32> to vector<16x96xf32>
    %30 = arith.addf %26, %29 : vector<16x96xf32>
    %31 = vector.extract_strided_slice %30 {offsets = [0, 0], sizes = [8, 16], strides = [1, 1]} : vector<16x96xf32> to vector<8x16xf32>
    %32 = vector.extract_strided_slice %30 {offsets = [0, 32], sizes = [8, 16], strides = [1, 1]} : vector<16x96xf32> to vector<8x16xf32>
    %33 = vector.extract_strided_slice %30 {offsets = [0, 64], sizes = [8, 16], strides = [1, 1]} : vector<16x96xf32> to vector<8x16xf32>
    %34 = tpu.transpose %32, [1, 0] : vector<8x16xf32> -> vector<16x8xf32>
    %cst_17 = arith.constant dense<0.000000e+00> : vector<8x8xf32>
    %35 = tpu.matmul %31, %34, %cst_17 {dimension_numbers = #tpu.dot_dimension_numbers<[1], [0], [0], [1], [0, 0, 1, 1], [], []>} : vector<8x16xf32>, vector<16x8xf32>, vector<8x8xf32> -> vector<8x8xf32>
    %cst_18 = arith.constant dense<0xFF800000> : vector<8xf32>
    %36 = vector.multi_reduction <maximumf>, %35, %cst_18 [1] : vector<8x8xf32> to vector<8xf32>
    %37 = vector.shape_cast %36 : vector<8xf32> to vector<8x1xf32>
    %38 = vector.broadcast %37 : vector<8x1xf32> to vector<8x8xf32>
    %39 = arith.subf %35, %38 : vector<8x8xf32>
    %40 = math.exp %39 : vector<8x8xf32>
    %cst_19 = arith.constant dense<0.000000e+00> : vector<8xf32>
    %41 = vector.multi_reduction <add>, %40, %cst_19 [1] : vector<8x8xf32> to vector<8xf32>
    %42 = vector.shape_cast %41 : vector<8xf32> to vector<8x1xf32>
    %43 = tpu.reciprocal %42 {approx = true} : vector<8x1xf32> -> vector<8x1xf32>
    %44 = vector.broadcast %43 : vector<8x1xf32> to vector<8x8xf32>
    %45 = arith.mulf %40, %44 : vector<8x8xf32>
    %cst_20 = arith.constant dense<0.000000e+00> : vector<8x16xf32>
    %46 = tpu.matmul %45, %33, %cst_20 {dimension_numbers = #tpu.dot_dimension_numbers<[1], [0], [0], [1], [0, 0, 1, 1], [], []>} : vector<8x8xf32>, vector<8x16xf32>, vector<8x16xf32> -> vector<8x16xf32>
    %c0_21 = arith.constant 0 : index
    %c0_22 = arith.constant 0 : index
    %47 = vector.load %arg20[%c0_21, %c0_22] : memref<16x32xf32, #tpu.memory_space<vmem>>, vector<8x16xf32>
    tpu.vector_store %arg20[%c0_21, %c0_22], %46 {strides = array<i32>} : memref<16x32xf32, #tpu.memory_space<vmem>>, vector<8x16xf32>,
    %48 = vector.extract_strided_slice %30 {offsets = [0, 16], sizes = [8, 16], strides = [1, 1]} : vector<16x96xf32> to vector<8x16xf32>
    %49 = vector.extract_strided_slice %30 {offsets = [0, 48], sizes = [8, 16], strides = [1, 1]} : vector<16x96xf32> to vector<8x16xf32>
    %50 = vector.extract_strided_slice %30 {offsets = [0, 80], sizes = [8, 16], strides = [1, 1]} : vector<16x96xf32> to vector<8x16xf32>
    %51 = tpu.transpose %49, [1, 0] : vector<8x16xf32> -> vector<16x8xf32>
    %cst_23 = arith.constant dense<0.000000e+00> : vector<8x8xf32>
    %52 = tpu.matmul %48, %51, %cst_23 {dimension_numbers = #tpu.dot_dimension_numbers<[1], [0], [0], [1], [0, 0, 1, 1], [], []>} : vector<8x16xf32>, vector<16x8xf32>, vector<8x8xf32> -> vector<8x8xf32>
    %cst_24 = arith.constant dense<0xFF800000> : vector<8xf32>
    %53 = vector.multi_reduction <maximumf>, %52, %cst_24 [1] : vector<8x8xf32> to vector<8xf32>
    %54 = vector.shape_cast %53 : vector<8xf32> to vector<8x1xf32>
    %55 = vector.broadcast %54 : vector<8x1xf32> to vector<8x8xf32>
    %56 = arith.subf %52, %55 : vector<8x8xf32>
    %57 = math.exp %56 : vector<8x8xf32>
    %cst_25 = arith.constant dense<0.000000e+00> : vector<8xf32>
    %58 = vector.multi_reduction <add>, %57, %cst_25 [1] : vector<8x8xf32> to vector<8xf32>
    %59 = vector.shape_cast %58 : vector<8xf32> to vector<8x1xf32>
    %60 = tpu.reciprocal %59 {approx = true} : vector<8x1xf32> -> vector<8x1xf32>
    %61 = vector.broadcast %60 : vector<8x1xf32> to vector<8x8xf32>
    %62 = arith.mulf %57, %61 : vector<8x8xf32>
    %cst_26 = arith.constant dense<0.000000e+00> : vector<8x16xf32>
    %63 = tpu.matmul %62, %50, %cst_26 {dimension_numbers = #tpu.dot_dimension_numbers<[1], [0], [0], [1], [0, 0, 1, 1], [], []>} : vector<8x8xf32>, vector<8x16xf32>, vector<8x16xf32> -> vector<8x16xf32>
    %c0_27 = arith.constant 0 : index
    %c16 = arith.constant 16 : index
    %64 = vector.load %arg20[%c0_27, %c16] : memref<16x32xf32, #tpu.memory_space<vmem>>, vector<8x16xf32>
    tpu.vector_store %arg20[%c0_27, %c16], %63 {strides = array<i32>} : memref<16x32xf32, #tpu.memory_space<vmem>>, vector<8x16xf32>,
    %65 = vector.extract_strided_slice %30 {offsets = [8, 0], sizes = [8, 16], strides = [1, 1]} : vector<16x96xf32> to vector<8x16xf32>
    %66 = vector.extract_strided_slice %30 {offsets = [8, 32], sizes = [8, 16], strides = [1, 1]} : vector<16x96xf32> to vector<8x16xf32>
    %67 = vector.extract_strided_slice %30 {offsets = [8, 64], sizes = [8, 16], strides = [1, 1]} : vector<16x96xf32> to vector<8x16xf32>
    %68 = tpu.transpose %66, [1, 0] : vector<8x16xf32> -> vector<16x8xf32>
    %cst_28 = arith.constant dense<0.000000e+00> : vector<8x8xf32>
    %69 = tpu.matmul %65, %68, %cst_28 {dimension_numbers = #tpu.dot_dimension_numbers<[1], [0], [0], [1], [0, 0, 1, 1], [], []>} : vector<8x16xf32>, vector<16x8xf32>, vector<8x8xf32> -> vector<8x8xf32>
    %cst_29 = arith.constant dense<0xFF800000> : vector<8xf32>
    %70 = vector.multi_reduction <maximumf>, %69, %cst_29 [1] : vector<8x8xf32> to vector<8xf32>
    %71 = vector.shape_cast %70 : vector<8xf32> to vector<8x1xf32>
    %72 = vector.broadcast %71 : vector<8x1xf32> to vector<8x8xf32>
    %73 = arith.subf %69, %72 : vector<8x8xf32>
    %74 = math.exp %73 : vector<8x8xf32>
    %cst_30 = arith.constant dense<0.000000e+00> : vector<8xf32>
    %75 = vector.multi_reduction <add>, %74, %cst_30 [1] : vector<8x8xf32> to vector<8xf32>
    %76 = vector.shape_cast %75 : vector<8xf32> to vector<8x1xf32>
    %77 = tpu.reciprocal %76 {approx = true} : vector<8x1xf32> -> vector<8x1xf32>
    %78 = vector.broadcast %77 : vector<8x1xf32> to vector<8x8xf32>
    %79 = arith.mulf %74, %78 : vector<8x8xf32>
    %cst_31 = arith.constant dense<0.000000e+00> : vector<8x16xf32>
    %80 = tpu.matmul %79, %67, %cst_31 {dimension_numbers = #tpu.dot_dimension_numbers<[1], [0], [0], [1], [0, 0, 1, 1], [], []>} : vector<8x8xf32>, vector<8x16xf32>, vector<8x16xf32> -> vector<8x16xf32>
    %c8 = arith.constant 8 : index
    %c0_32 = arith.constant 0 : index
    %81 = vector.load %arg20[%c8, %c0_32] : memref<16x32xf32, #tpu.memory_space<vmem>>, vector<8x16xf32>
    tpu.vector_store %arg20[%c8, %c0_32], %80 {strides = array<i32>} : memref<16x32xf32, #tpu.memory_space<vmem>>, vector<8x16xf32>,
    %82 = vector.extract_strided_slice %30 {offsets = [8, 16], sizes = [8, 16], strides = [1, 1]} : vector<16x96xf32> to vector<8x16xf32>
    %83 = vector.extract_strided_slice %30 {offsets = [8, 48], sizes = [8, 16], strides = [1, 1]} : vector<16x96xf32> to vector<8x16xf32>
    %84 = vector.extract_strided_slice %30 {offsets = [8, 80], sizes = [8, 16], strides = [1, 1]} : vector<16x96xf32> to vector<8x16xf32>
    %85 = tpu.transpose %83, [1, 0] : vector<8x16xf32> -> vector<16x8xf32>
    %cst_33 = arith.constant dense<0.000000e+00> : vector<8x8xf32>
    %86 = tpu.matmul %82, %85, %cst_33 {dimension_numbers = #tpu.dot_dimension_numbers<[1], [0], [0], [1], [0, 0, 1, 1], [], []>} : vector<8x16xf32>, vector<16x8xf32>, vector<8x8xf32> -> vector<8x8xf32>
    %cst_34 = arith.constant dense<0xFF800000> : vector<8xf32>
    %87 = vector.multi_reduction <maximumf>, %86, %cst_34 [1] : vector<8x8xf32> to vector<8xf32>
    %88 = vector.shape_cast %87 : vector<8xf32> to vector<8x1xf32>
    %89 = vector.broadcast %88 : vector<8x1xf32> to vector<8x8xf32>
    %90 = arith.subf %86, %89 : vector<8x8xf32>
    %91 = math.exp %90 : vector<8x8xf32>
    %cst_35 = arith.constant dense<0.000000e+00> : vector<8xf32>
    %92 = vector.multi_reduction <add>, %91, %cst_35 [1] : vector<8x8xf32> to vector<8xf32>
    %93 = vector.shape_cast %92 : vector<8xf32> to vector<8x1xf32>
    %94 = tpu.reciprocal %93 {approx = true} : vector<8x1xf32> -> vector<8x1xf32>
    %95 = vector.broadcast %94 : vector<8x1xf32> to vector<8x8xf32>
    %96 = arith.mulf %91, %95 : vector<8x8xf32>
    %cst_36 = arith.constant dense<0.000000e+00> : vector<8x16xf32>
    %97 = tpu.matmul %96, %84, %cst_36 {dimension_numbers = #tpu.dot_dimension_numbers<[1], [0], [0], [1], [0, 0, 1, 1], [], []>} : vector<8x8xf32>, vector<8x16xf32>, vector<8x16xf32> -> vector<8x16xf32>
    %c8_37 = arith.constant 8 : index
    %c16_38 = arith.constant 16 : index
    %98 = vector.load %arg20[%c8_37, %c16_38] : memref<16x32xf32, #tpu.memory_space<vmem>>, vector<8x16xf32>
    tpu.vector_store %arg20[%c8_37, %c16_38], %97 {strides = array<i32>} : memref<16x32xf32, #tpu.memory_space<vmem>>, vector<8x16xf32>,
    %c0_39 = arith.constant 0 : index
    %c0_40 = arith.constant 0 : index
    %99 = vector.load %arg20[%c0_39, %c0_40] : memref<16x32xf32, #tpu.memory_space<vmem>>, vector<16x32xf32>
    %c0_41 = arith.constant 0 : index
    %c0_42 = arith.constant 0 : index
    %c0_43 = arith.constant 0 : index
    %100 = vector.load %arg5[%c0_41, %c0_42, %c0_43] : memref<2x32x32xf32, #tpu.memory_space<vmem>>, vector<1x32x32xf32>
    %101 = vector.shape_cast %100 : vector<1x32x32xf32> to vector<32x32xf32>
    %cst_44 = arith.constant dense<0.000000e+00> : vector<16x32xf32>
    %102 = tpu.matmul %99, %101, %cst_44 {dimension_numbers = #tpu.dot_dimension_numbers<[1], [0], [0], [1], [0, 0, 1, 1], [], []>} : vector<16x32xf32>, vector<32x32xf32>, vector<16x32xf32> -> vector<16x32xf32>
    %c0_45 = arith.constant 0 : index
    %c0_46 = arith.constant 0 : index
    %c0_47 = arith.constant 0 : index
    %103 = vector.load %arg6[%c0_45, %c0_46, %c0_47] : memref<2x1x32xf32, #tpu.memory_space<vmem>>, vector<1x1x32xf32>
    %104 = vector.shape_cast %103 : vector<1x1x32xf32> to vector<1x32xf32>
    %105 = vector.broadcast %104 : vector<1x32xf32> to vector<16x32xf32>
    %106 = arith.addf %102, %105 : vector<16x32xf32>
    %107 = arith.addf %23, %106 : vector<16x32xf32>
    %c0_48 = arith.constant 0 : index
    %c0_49 = arith.constant 0 : index
    %c0_50 = arith.constant 0 : index
    %108 = vector.load %arg7[%c0_48, %c0_49, %c0_50] : memref<2x1x32xf32, #tpu.memory_space<vmem>>, vector<1x1x32xf32>
    %109 = vector.shape_cast %108 : vector<1x1x32xf32> to vector<1x32xf32>
    %c0_51 = arith.constant 0 : index
    %c0_52 = arith.constant 0 : index
    %c0_53 = arith.constant 0 : index
    %110 = vector.load %arg8[%c0_51, %c0_52, %c0_53] : memref<2x1x32xf32, #tpu.memory_space<vmem>>, vector<1x1x32xf32>
    %111 = vector.shape_cast %110 : vector<1x1x32xf32> to vector<1x32xf32>
    %cst_54 = arith.constant dense<0.000000e+00> : vector<16xf32>
    %112 = vector.multi_reduction <add>, %107, %cst_54 [1] : vector<16x32xf32> to vector<16xf32>
    %113 = vector.shape_cast %112 : vector<16xf32> to vector<16x1xf32>
    %cst_55 = arith.constant 3.200000e+01 : f32
    %114 = vector.broadcast %cst_55 : f32 to vector<16x1xf32>
    %115 = arith.divf %113, %114 : vector<16x1xf32>
    %116 = vector.broadcast %115 : vector<16x1xf32> to vector<16x32xf32>
    %117 = arith.subf %107, %116 : vector<16x32xf32>
    %118 = arith.mulf %117, %117 : vector<16x32xf32>
    %cst_56 = arith.constant dense<0.000000e+00> : vector<16xf32>
    %119 = vector.multi_reduction <add>, %118, %cst_56 [1] : vector<16x32xf32> to vector<16xf32>
    %120 = vector.shape_cast %119 : vector<16xf32> to vector<16x1xf32>
    %cst_57 = arith.constant 3.200000e+01 : f32
    %121 = vector.broadcast %cst_57 : f32 to vector<16x1xf32>
    %122 = arith.divf %120, %121 : vector<16x1xf32>
    %cst_58 = arith.constant 9.99999996E-13 : f32
    %123 = vector.broadcast %cst_58 : f32 to vector<16x1xf32>
    %124 = arith.addf %122, %123 : vector<16x1xf32>
    %125 = math.rsqrt %124 : vector<16x1xf32>
    %126 = vector.broadcast %125 : vector<16x1xf32> to vector<16x32xf32>
    %127 = arith.mulf %117, %126 : vector<16x32xf32>
    %128 = vector.broadcast %109 : vector<1x32xf32> to vector<16x32xf32>
    %129 = arith.mulf %127, %128 : vector<16x32xf32>
    %130 = vector.broadcast %111 : vector<1x32xf32> to vector<16x32xf32>
    %131 = arith.addf %129, %130 : vector<16x32xf32>
    %c0_59 = arith.constant 0 : index
    %c0_60 = arith.constant 0 : index
    %c0_61 = arith.constant 0 : index
    %132 = vector.load %arg9[%c0_59, %c0_60, %c0_61] : memref<2x32x64xf32, #tpu.memory_space<vmem>>, vector<1x32x64xf32>
    %133 = vector.shape_cast %132 : vector<1x32x64xf32> to vector<32x64xf32>
    %cst_62 = arith.constant dense<0.000000e+00> : vector<16x64xf32>
    %134 = tpu.matmul %131, %133, %cst_62 {dimension_numbers = #tpu.dot_dimension_numbers<[1], [0], [0], [1], [0, 0, 1, 1], [], []>} : vector<16x32xf32>, vector<32x64xf32>, vector<16x64xf32> -> vector<16x64xf32>
    %c0_63 = arith.constant 0 : index
    %c0_64 = arith.constant 0 : index
    %c0_65 = arith.constant 0 : index
    %135 = vector.load %arg10[%c0_63, %c0_64, %c0_65] : memref<2x1x64xf32, #tpu.memory_space<vmem>>, vector<1x1x64xf32>
    %136 = vector.shape_cast %135 : vector<1x1x64xf32> to vector<1x64xf32>
    %137 = vector.broadcast %136 : vector<1x64xf32> to vector<16x64xf32>
    %138 = arith.addf %134, %137 : vector<16x64xf32>
    %cst_66 = arith.constant 5.000000e-01 : f32
    %139 = vector.broadcast %cst_66 : f32 to vector<16x64xf32>
    %140 = arith.mulf %139, %138 : vector<16x64xf32>
    %cst_67 = arith.constant 4.471500e-02 : f32
    %141 = vector.broadcast %cst_67 : f32 to vector<16x64xf32>
    %142 = arith.mulf %141, %138 : vector<16x64xf32>
    %143 = arith.mulf %142, %138 : vector<16x64xf32>
    %144 = arith.mulf %143, %138 : vector<16x64xf32>
    %145 = arith.addf %138, %144 : vector<16x64xf32>
    %cst_68 = arith.constant 0.797884583 : f32
    %146 = vector.broadcast %cst_68 : f32 to vector<16x64xf32>
    %147 = arith.mulf %146, %145 : vector<16x64xf32>
    %148 = math.tanh %147 : vector<16x64xf32>
    %cst_69 = arith.constant 1.000000e+00 : f32
    %149 = vector.broadcast %cst_69 : f32 to vector<16x64xf32>
    %150 = arith.addf %149, %148 : vector<16x64xf32>
    %151 = arith.mulf %140, %150 : vector<16x64xf32>
    %c0_70 = arith.constant 0 : index
    %c0_71 = arith.constant 0 : index
    %c0_72 = arith.constant 0 : index
    %152 = vector.load %arg11[%c0_70, %c0_71, %c0_72] : memref<2x64x32xf32, #tpu.memory_space<vmem>>, vector<1x64x32xf32>
    %153 = vector.shape_cast %152 : vector<1x64x32xf32> to vector<64x32xf32>
    %cst_73 = arith.constant dense<0.000000e+00> : vector<16x32xf32>
    %154 = tpu.matmul %151, %153, %cst_73 {dimension_numbers = #tpu.dot_dimension_numbers<[1], [0], [0], [1], [0, 0, 1, 1], [], []>} : vector<16x64xf32>, vector<64x32xf32>, vector<16x32xf32> -> vector<16x32xf32>
    %c0_74 = arith.constant 0 : index
    %c0_75 = arith.constant 0 : index
    %c0_76 = arith.constant 0 : index
    %155 = vector.load %arg12[%c0_74, %c0_75, %c0_76] : memref<2x1x32xf32, #tpu.memory_space<vmem>>, vector<1x1x32xf32>
    %156 = vector.shape_cast %155 : vector<1x1x32xf32> to vector<1x32xf32>
    %157 = vector.broadcast %156 : vector<1x32xf32> to vector<16x32xf32>
    %158 = arith.addf %154, %157 : vector<16x32xf32>
    %159 = arith.addf %131, %158 : vector<16x32xf32>
    %c0_77 = arith.constant 0 : index
    %c0_78 = arith.constant 0 : index
    %c0_79 = arith.constant 0 : index
    %160 = vector.load %arg13[%c0_77, %c0_78, %c0_79] : memref<2x1x32xf32, #tpu.memory_space<vmem>>, vector<1x1x32xf32>
    %161 = vector.shape_cast %160 : vector<1x1x32xf32> to vector<1x32xf32>
    %c0_80 = arith.constant 0 : index
    %c0_81 = arith.constant 0 : index
    %c0_82 = arith.constant 0 : index
    %162 = vector.load %arg14[%c0_80, %c0_81, %c0_82] : memref<2x1x32xf32, #tpu.memory_space<vmem>>, vector<1x1x32xf32>
    %163 = vector.shape_cast %162 : vector<1x1x32xf32> to vector<1x32xf32>
    %cst_83 = arith.constant dense<0.000000e+00> : vector<16xf32>
    %164 = vector.multi_reduction <add>, %159, %cst_83 [1] : vector<16x32xf32> to vector<16xf32>
    %165 = vector.shape_cast %164 : vector<16xf32> to vector<16x1xf32>
    %cst_84 = arith.constant 3.200000e+01 : f32
    %166 = vector.broadcast %cst_84 : f32 to vector<16x1xf32>
    %167 = arith.divf %165, %166 : vector<16x1xf32>
    %168 = vector.broadcast %167 : vector<16x1xf32> to vector<16x32xf32>
    %169 = arith.subf %159, %168 : vector<16x32xf32>
    %170 = arith.mulf %169, %169 : vector<16x32xf32>
    %cst_85 = arith.constant dense<0.000000e+00> : vector<16xf32>
    %171 = vector.multi_reduction <add>, %170, %cst_85 [1] : vector<16x32xf32> to vector<16xf32>
    %172 = vector.shape_cast %171 : vector<16xf32> to vector<16x1xf32>
    %cst_86 = arith.constant 3.200000e+01 : f32
    %173 = vector.broadcast %cst_86 : f32 to vector<16x1xf32>
    %174 = arith.divf %172, %173 : vector<16x1xf32>
    %cst_87 = arith.constant 9.99999996E-13 : f32
    %175 = vector.broadcast %cst_87 : f32 to vector<16x1xf32>
    %176 = arith.addf %174, %175 : vector<16x1xf32>
    %177 = math.rsqrt %176 : vector<16x1xf32>
    %178 = vector.broadcast %177 : vector<16x1xf32> to vector<16x32xf32>
    %179 = arith.mulf %169, %178 : vector<16x32xf32>
    %180 = vector.broadcast %161 : vector<1x32xf32> to vector<16x32xf32>
    %181 = arith.mulf %179, %180 : vector<16x32xf32>
    %182 = vector.broadcast %163 : vector<1x32xf32> to vector<16x32xf32>
    %183 = arith.addf %181, %182 : vector<16x32xf32>
    %c1 = arith.constant 1 : index
    %c0_88 = arith.constant 0 : index
    %c0_89 = arith.constant 0 : index
    %184 = vector.load %arg3[%c1, %c0_88, %c0_89] : memref<2x32x96xf32, #tpu.memory_space<vmem>>, vector<1x32x96xf32>
    %185 = vector.shape_cast %184 : vector<1x32x96xf32> to vector<32x96xf32>
    %cst_90 = arith.constant dense<0.000000e+00> : vector<16x96xf32>
    %186 = tpu.matmul %183, %185, %cst_90 {dimension_numbers = #tpu.dot_dimension_numbers<[1], [0], [0], [1], [0, 0, 1, 1], [], []>} : vector<16x32xf32>, vector<32x96xf32>, vector<16x96xf32> -> vector<16x96xf32>
    %c1_91 = arith.constant 1 : index
    %c0_92 = arith.constant 0 : index
    %c0_93 = arith.constant 0 : index
    %187 = vector.load %arg4[%c1_91, %c0_92, %c0_93] : memref<2x1x96xf32, #tpu.memory_space<vmem>>, vector<1x1x96xf32>
    %188 = vector.shape_cast %187 : vector<1x1x96xf32> to vector<1x96xf32>
    %189 = vector.broadcast %188 : vector<1x96xf32> to vector<16x96xf32>
    %190 = arith.addf %186, %189 : vector<16x96xf32>
    %191 = vector.extract_strided_slice %190 {offsets = [0, 0], sizes = [8, 16], strides = [1, 1]} : vector<16x96xf32> to vector<8x16xf32>
    %192 = vector.extract_strided_slice %190 {offsets = [0, 32], sizes = [8, 16], strides = [1, 1]} : vector<16x96xf32> to vector<8x16xf32>
    %193 = vector.extract_strided_slice %190 {offsets = [0, 64], sizes = [8, 16], strides = [1, 1]} : vector<16x96xf32> to vector<8x16xf32>
    %194 = tpu.transpose %192, [1, 0] : vector<8x16xf32> -> vector<16x8xf32>
    %cst_94 = arith.constant dense<0.000000e+00> : vector<8x8xf32>
    %195 = tpu.matmul %191, %194, %cst_94 {dimension_numbers = #tpu.dot_dimension_numbers<[1], [0], [0], [1], [0, 0, 1, 1], [], []>} : vector<8x16xf32>, vector<16x8xf32>, vector<8x8xf32> -> vector<8x8xf32>
    %cst_95 = arith.constant dense<0xFF800000> : vector<8xf32>
    %196 = vector.multi_reduction <maximumf>, %195, %cst_95 [1] : vector<8x8xf32> to vector<8xf32>
    %197 = vector.shape_cast %196 : vector<8xf32> to vector<8x1xf32>
    %198 = vector.broadcast %197 : vector<8x1xf32> to vector<8x8xf32>
    %199 = arith.subf %195, %198 : vector<8x8xf32>
    %200 = math.exp %199 : vector<8x8xf32>
    %cst_96 = arith.constant dense<0.000000e+00> : vector<8xf32>
    %201 = vector.multi_reduction <add>, %200, %cst_96 [1] : vector<8x8xf32> to vector<8xf32>
    %202 = vector.shape_cast %201 : vector<8xf32> to vector<8x1xf32>
    %203 = tpu.reciprocal %202 {approx = true} : vector<8x1xf32> -> vector<8x1xf32>
    %204 = vector.broadcast %203 : vector<8x1xf32> to vector<8x8xf32>
    %205 = arith.mulf %200, %204 : vector<8x8xf32>
    %cst_97 = arith.constant dense<0.000000e+00> : vector<8x16xf32>
    %206 = tpu.matmul %205, %193, %cst_97 {dimension_numbers = #tpu.dot_dimension_numbers<[1], [0], [0], [1], [0, 0, 1, 1], [], []>} : vector<8x8xf32>, vector<8x16xf32>, vector<8x16xf32> -> vector<8x16xf32>
    %c0_98 = arith.constant 0 : index
    %c0_99 = arith.constant 0 : index
    %207 = vector.load %arg20[%c0_98, %c0_99] : memref<16x32xf32, #tpu.memory_space<vmem>>, vector<8x16xf32>
    tpu.vector_store %arg20[%c0_98, %c0_99], %206 {strides = array<i32>} : memref<16x32xf32, #tpu.memory_space<vmem>>, vector<8x16xf32>,
    %208 = vector.extract_strided_slice %190 {offsets = [0, 16], sizes = [8, 16], strides = [1, 1]} : vector<16x96xf32> to vector<8x16xf32>
    %209 = vector.extract_strided_slice %190 {offsets = [0, 48], sizes = [8, 16], strides = [1, 1]} : vector<16x96xf32> to vector<8x16xf32>
    %210 = vector.extract_strided_slice %190 {offsets = [0, 80], sizes = [8, 16], strides = [1, 1]} : vector<16x96xf32> to vector<8x16xf32>
    %211 = tpu.transpose %209, [1, 0] : vector<8x16xf32> -> vector<16x8xf32>
    %cst_100 = arith.constant dense<0.000000e+00> : vector<8x8xf32>
    %212 = tpu.matmul %208, %211, %cst_100 {dimension_numbers = #tpu.dot_dimension_numbers<[1], [0], [0], [1], [0, 0, 1, 1], [], []>} : vector<8x16xf32>, vector<16x8xf32>, vector<8x8xf32> -> vector<8x8xf32>
    %cst_101 = arith.constant dense<0xFF800000> : vector<8xf32>
    %213 = vector.multi_reduction <maximumf>, %212, %cst_101 [1] : vector<8x8xf32> to vector<8xf32>
    %214 = vector.shape_cast %213 : vector<8xf32> to vector<8x1xf32>
    %215 = vector.broadcast %214 : vector<8x1xf32> to vector<8x8xf32>
    %216 = arith.subf %212, %215 : vector<8x8xf32>
    %217 = math.exp %216 : vector<8x8xf32>
    %cst_102 = arith.constant dense<0.000000e+00> : vector<8xf32>
    %218 = vector.multi_reduction <add>, %217, %cst_102 [1] : vector<8x8xf32> to vector<8xf32>
    %219 = vector.shape_cast %218 : vector<8xf32> to vector<8x1xf32>
    %220 = tpu.reciprocal %219 {approx = true} : vector<8x1xf32> -> vector<8x1xf32>
    %221 = vector.broadcast %220 : vector<8x1xf32> to vector<8x8xf32>
    %222 = arith.mulf %217, %221 : vector<8x8xf32>
    %cst_103 = arith.constant dense<0.000000e+00> : vector<8x16xf32>
    %223 = tpu.matmul %222, %210, %cst_103 {dimension_numbers = #tpu.dot_dimension_numbers<[1], [0], [0], [1], [0, 0, 1, 1], [], []>} : vector<8x8xf32>, vector<8x16xf32>, vector<8x16xf32> -> vector<8x16xf32>
    %c0_104 = arith.constant 0 : index
    %c16_105 = arith.constant 16 : index
    %224 = vector.load %arg20[%c0_104, %c16_105] : memref<16x32xf32, #tpu.memory_space<vmem>>, vector<8x16xf32>
    tpu.vector_store %arg20[%c0_104, %c16_105], %223 {strides = array<i32>} : memref<16x32xf32, #tpu.memory_space<vmem>>, vector<8x16xf32>,
    %225 = vector.extract_strided_slice %190 {offsets = [8, 0], sizes = [8, 16], strides = [1, 1]} : vector<16x96xf32> to vector<8x16xf32>
    %226 = vector.extract_strided_slice %190 {offsets = [8, 32], sizes = [8, 16], strides = [1, 1]} : vector<16x96xf32> to vector<8x16xf32>
    %227 = vector.extract_strided_slice %190 {offsets = [8, 64], sizes = [8, 16], strides = [1, 1]} : vector<16x96xf32> to vector<8x16xf32>
    %228 = tpu.transpose %226, [1, 0] : vector<8x16xf32> -> vector<16x8xf32>
    %cst_106 = arith.constant dense<0.000000e+00> : vector<8x8xf32>
    %229 = tpu.matmul %225, %228, %cst_106 {dimension_numbers = #tpu.dot_dimension_numbers<[1], [0], [0], [1], [0, 0, 1, 1], [], []>} : vector<8x16xf32>, vector<16x8xf32>, vector<8x8xf32> -> vector<8x8xf32>
    %cst_107 = arith.constant dense<0xFF800000> : vector<8xf32>
    %230 = vector.multi_reduction <maximumf>, %229, %cst_107 [1] : vector<8x8xf32> to vector<8xf32>
    %231 = vector.shape_cast %230 : vector<8xf32> to vector<8x1xf32>
    %232 = vector.broadcast %231 : vector<8x1xf32> to vector<8x8xf32>
    %233 = arith.subf %229, %232 : vector<8x8xf32>
    %234 = math.exp %233 : vector<8x8xf32>
    %cst_108 = arith.constant dense<0.000000e+00> : vector<8xf32>
    %235 = vector.multi_reduction <add>, %234, %cst_108 [1] : vector<8x8xf32> to vector<8xf32>
    %236 = vector.shape_cast %235 : vector<8xf32> to vector<8x1xf32>
    %237 = tpu.reciprocal %236 {approx = true} : vector<8x1xf32> -> vector<8x1xf32>
    %238 = vector.broadcast %237 : vector<8x1xf32> to vector<8x8xf32>
    %239 = arith.mulf %234, %238 : vector<8x8xf32>
    %cst_109 = arith.constant dense<0.000000e+00> : vector<8x16xf32>
    %240 = tpu.matmul %239, %227, %cst_109 {dimension_numbers = #tpu.dot_dimension_numbers<[1], [0], [0], [1], [0, 0, 1, 1], [], []>} : vector<8x8xf32>, vector<8x16xf32>, vector<8x16xf32> -> vector<8x16xf32>
    %c8_110 = arith.constant 8 : index
    %c0_111 = arith.constant 0 : index
    %241 = vector.load %arg20[%c8_110, %c0_111] : memref<16x32xf32, #tpu.memory_space<vmem>>, vector<8x16xf32>
    tpu.vector_store %arg20[%c8_110, %c0_111], %240 {strides = array<i32>} : memref<16x32xf32, #tpu.memory_space<vmem>>, vector<8x16xf32>,
    %242 = vector.extract_strided_slice %190 {offsets = [8, 16], sizes = [8, 16], strides = [1, 1]} : vector<16x96xf32> to vector<8x16xf32>
    %243 = vector.extract_strided_slice %190 {offsets = [8, 48], sizes = [8, 16], strides = [1, 1]} : vector<16x96xf32> to vector<8x16xf32>
    %244 = vector.extract_strided_slice %190 {offsets = [8, 80], sizes = [8, 16], strides = [1, 1]} : vector<16x96xf32> to vector<8x16xf32>
    %245 = tpu.transpose %243, [1, 0] : vector<8x16xf32> -> vector<16x8xf32>
    %cst_112 = arith.constant dense<0.000000e+00> : vector<8x8xf32>
    %246 = tpu.matmul %242, %245, %cst_112 {dimension_numbers = #tpu.dot_dimension_numbers<[1], [0], [0], [1], [0, 0, 1, 1], [], []>} : vector<8x16xf32>, vector<16x8xf32>, vector<8x8xf32> -> vector<8x8xf32>
    %cst_113 = arith.constant dense<0xFF800000> : vector<8xf32>
    %247 = vector.multi_reduction <maximumf>, %246, %cst_113 [1] : vector<8x8xf32> to vector<8xf32>
    %248 = vector.shape_cast %247 : vector<8xf32> to vector<8x1xf32>
    %249 = vector.broadcast %248 : vector<8x1xf32> to vector<8x8xf32>
    %250 = arith.subf %246, %249 : vector<8x8xf32>
    %251 = math.exp %250 : vector<8x8xf32>
    %cst_114 = arith.constant dense<0.000000e+00> : vector<8xf32>
    %252 = vector.multi_reduction <add>, %251, %cst_114 [1] : vector<8x8xf32> to vector<8xf32>
    %253 = vector.shape_cast %252 : vector<8xf32> to vector<8x1xf32>
    %254 = tpu.reciprocal %253 {approx = true} : vector<8x1xf32> -> vector<8x1xf32>
    %255 = vector.broadcast %254 : vector<8x1xf32> to vector<8x8xf32>
    %256 = arith.mulf %251, %255 : vector<8x8xf32>
    %cst_115 = arith.constant dense<0.000000e+00> : vector<8x16xf32>
    %257 = tpu.matmul %256, %244, %cst_115 {dimension_numbers = #tpu.dot_dimension_numbers<[1], [0], [0], [1], [0, 0, 1, 1], [], []>} : vector<8x8xf32>, vector<8x16xf32>, vector<8x16xf32> -> vector<8x16xf32>
    %c8_116 = arith.constant 8 : index
    %c16_117 = arith.constant 16 : index
    %258 = vector.load %arg20[%c8_116, %c16_117] : memref<16x32xf32, #tpu.memory_space<vmem>>, vector<8x16xf32>
    tpu.vector_store %arg20[%c8_116, %c16_117], %257 {strides = array<i32>} : memref<16x32xf32, #tpu.memory_space<vmem>>, vector<8x16xf32>,
    %c0_118 = arith.constant 0 : index
    %c0_119 = arith.constant 0 : index
    %259 = vector.load %arg20[%c0_118, %c0_119] : memref<16x32xf32, #tpu.memory_space<vmem>>, vector<16x32xf32>
    %c1_120 = arith.constant 1 : index
    %c0_121 = arith.constant 0 : index
    %c0_122 = arith.constant 0 : index
    %260 = vector.load %arg5[%c1_120, %c0_121, %c0_122] : memref<2x32x32xf32, #tpu.memory_space<vmem>>, vector<1x32x32xf32>
    %261 = vector.shape_cast %260 : vector<1x32x32xf32> to vector<32x32xf32>
    %cst_123 = arith.constant dense<0.000000e+00> : vector<16x32xf32>
    %262 = tpu.matmul %259, %261, %cst_123 {dimension_numbers = #tpu.dot_dimension_numbers<[1], [0], [0], [1], [0, 0, 1, 1], [], []>} : vector<16x32xf32>, vector<32x32xf32>, vector<16x32xf32> -> vector<16x32xf32>
    %c1_124 = arith.constant 1 : index
    %c0_125 = arith.constant 0 : index
    %c0_126 = arith.constant 0 : index
    %263 = vector.load %arg6[%c1_124, %c0_125, %c0_126] : memref<2x1x32xf32, #tpu.memory_space<vmem>>, vector<1x1x32xf32>
    %264 = vector.shape_cast %263 : vector<1x1x32xf32> to vector<1x32xf32>
    %265 = vector.broadcast %264 : vector<1x32xf32> to vector<16x32xf32>
    %266 = arith.addf %262, %265 : vector<16x32xf32>
    %267 = arith.addf %183, %266 : vector<16x32xf32>
    %c1_127 = arith.constant 1 : index
    %c0_128 = arith.constant 0 : index
    %c0_129 = arith.constant 0 : index
    %268 = vector.load %arg7[%c1_127, %c0_128, %c0_129] : memref<2x1x32xf32, #tpu.memory_space<vmem>>, vector<1x1x32xf32>
    %269 = vector.shape_cast %268 : vector<1x1x32xf32> to vector<1x32xf32>
    %c1_130 = arith.constant 1 : index
    %c0_131 = arith.constant 0 : index
    %c0_132 = arith.constant 0 : index
    %270 = vector.load %arg8[%c1_130, %c0_131, %c0_132] : memref<2x1x32xf32, #tpu.memory_space<vmem>>, vector<1x1x32xf32>
    %271 = vector.shape_cast %270 : vector<1x1x32xf32> to vector<1x32xf32>
    %cst_133 = arith.constant dense<0.000000e+00> : vector<16xf32>
    %272 = vector.multi_reduction <add>, %267, %cst_133 [1] : vector<16x32xf32> to vector<16xf32>
    %273 = vector.shape_cast %272 : vector<16xf32> to vector<16x1xf32>
    %cst_134 = arith.constant 3.200000e+01 : f32
    %274 = vector.broadcast %cst_134 : f32 to vector<16x1xf32>
    %275 = arith.divf %273, %274 : vector<16x1xf32>
    %276 = vector.broadcast %275 : vector<16x1xf32> to vector<16x32xf32>
    %277 = arith.subf %267, %276 : vector<16x32xf32>
    %278 = arith.mulf %277, %277 : vector<16x32xf32>
    %cst_135 = arith.constant dense<0.000000e+00> : vector<16xf32>
    %279 = vector.multi_reduction <add>, %278, %cst_135 [1] : vector<16x32xf32> to vector<16xf32>
    %280 = vector.shape_cast %279 : vector<16xf32> to vector<16x1xf32>
    %cst_136 = arith.constant 3.200000e+01 : f32
    %281 = vector.broadcast %cst_136 : f32 to vector<16x1xf32>
    %282 = arith.divf %280, %281 : vector<16x1xf32>
    %cst_137 = arith.constant 9.99999996E-13 : f32
    %283 = vector.broadcast %cst_137 : f32 to vector<16x1xf32>
    %284 = arith.addf %282, %283 : vector<16x1xf32>
    %285 = math.rsqrt %284 : vector<16x1xf32>
    %286 = vector.broadcast %285 : vector<16x1xf32> to vector<16x32xf32>
    %287 = arith.mulf %277, %286 : vector<16x32xf32>
    %288 = vector.broadcast %269 : vector<1x32xf32> to vector<16x32xf32>
    %289 = arith.mulf %287, %288 : vector<16x32xf32>
    %290 = vector.broadcast %271 : vector<1x32xf32> to vector<16x32xf32>
    %291 = arith.addf %289, %290 : vector<16x32xf32>
    %c1_138 = arith.constant 1 : index
    %c0_139 = arith.constant 0 : index
    %c0_140 = arith.constant 0 : index
    %292 = vector.load %arg9[%c1_138, %c0_139, %c0_140] : memref<2x32x64xf32, #tpu.memory_space<vmem>>, vector<1x32x64xf32>
    %293 = vector.shape_cast %292 : vector<1x32x64xf32> to vector<32x64xf32>
    %cst_141 = arith.constant dense<0.000000e+00> : vector<16x64xf32>
    %294 = tpu.matmul %291, %293, %cst_141 {dimension_numbers = #tpu.dot_dimension_numbers<[1], [0], [0], [1], [0, 0, 1, 1], [], []>} : vector<16x32xf32>, vector<32x64xf32>, vector<16x64xf32> -> vector<16x64xf32>
    %c1_142 = arith.constant 1 : index
    %c0_143 = arith.constant 0 : index
    %c0_144 = arith.constant 0 : index
    %295 = vector.load %arg10[%c1_142, %c0_143, %c0_144] : memref<2x1x64xf32, #tpu.memory_space<vmem>>, vector<1x1x64xf32>
    %296 = vector.shape_cast %295 : vector<1x1x64xf32> to vector<1x64xf32>
    %297 = vector.broadcast %296 : vector<1x64xf32> to vector<16x64xf32>
    %298 = arith.addf %294, %297 : vector<16x64xf32>
    %cst_145 = arith.constant 5.000000e-01 : f32
    %299 = vector.broadcast %cst_145 : f32 to vector<16x64xf32>
    %300 = arith.mulf %299, %298 : vector<16x64xf32>
    %cst_146 = arith.constant 4.471500e-02 : f32
    %301 = vector.broadcast %cst_146 : f32 to vector<16x64xf32>
    %302 = arith.mulf %301, %298 : vector<16x64xf32>
    %303 = arith.mulf %302, %298 : vector<16x64xf32>
    %304 = arith.mulf %303, %298 : vector<16x64xf32>
    %305 = arith.addf %298, %304 : vector<16x64xf32>
    %cst_147 = arith.constant 0.797884583 : f32
    %306 = vector.broadcast %cst_147 : f32 to vector<16x64xf32>
    %307 = arith.mulf %306, %305 : vector<16x64xf32>
    %308 = math.tanh %307 : vector<16x64xf32>
    %cst_148 = arith.constant 1.000000e+00 : f32
    %309 = vector.broadcast %cst_148 : f32 to vector<16x64xf32>
    %310 = arith.addf %309, %308 : vector<16x64xf32>
    %311 = arith.mulf %300, %310 : vector<16x64xf32>
    %c1_149 = arith.constant 1 : index
    %c0_150 = arith.constant 0 : index
    %c0_151 = arith.constant 0 : index
    %312 = vector.load %arg11[%c1_149, %c0_150, %c0_151] : memref<2x64x32xf32, #tpu.memory_space<vmem>>, vector<1x64x32xf32>
    %313 = vector.shape_cast %312 : vector<1x64x32xf32> to vector<64x32xf32>
    %cst_152 = arith.constant dense<0.000000e+00> : vector<16x32xf32>
    %314 = tpu.matmul %311, %313, %cst_152 {dimension_numbers = #tpu.dot_dimension_numbers<[1], [0], [0], [1], [0, 0, 1, 1], [], []>} : vector<16x64xf32>, vector<64x32xf32>, vector<16x32xf32> -> vector<16x32xf32>
    %c1_153 = arith.constant 1 : index
    %c0_154 = arith.constant 0 : index
    %c0_155 = arith.constant 0 : index
    %315 = vector.load %arg12[%c1_153, %c0_154, %c0_155] : memref<2x1x32xf32, #tpu.memory_space<vmem>>, vector<1x1x32xf32>
    %316 = vector.shape_cast %315 : vector<1x1x32xf32> to vector<1x32xf32>
    %317 = vector.broadcast %316 : vector<1x32xf32> to vector<16x32xf32>
    %318 = arith.addf %314, %317 : vector<16x32xf32>
    %319 = arith.addf %291, %318 : vector<16x32xf32>
    %c1_156 = arith.constant 1 : index
    %c0_157 = arith.constant 0 : index
    %c0_158 = arith.constant 0 : index
    %320 = vector.load %arg13[%c1_156, %c0_157, %c0_158] : memref<2x1x32xf32, #tpu.memory_space<vmem>>, vector<1x1x32xf32>
    %321 = vector.shape_cast %320 : vector<1x1x32xf32> to vector<1x32xf32>
    %c1_159 = arith.constant 1 : index
    %c0_160 = arith.constant 0 : index
    %c0_161 = arith.constant 0 : index
    %322 = vector.load %arg14[%c1_159, %c0_160, %c0_161] : memref<2x1x32xf32, #tpu.memory_space<vmem>>, vector<1x1x32xf32>
    %323 = vector.shape_cast %322 : vector<1x1x32xf32> to vector<1x32xf32>
    %cst_162 = arith.constant dense<0.000000e+00> : vector<16xf32>
    %324 = vector.multi_reduction <add>, %319, %cst_162 [1] : vector<16x32xf32> to vector<16xf32>
    %325 = vector.shape_cast %324 : vector<16xf32> to vector<16x1xf32>
    %cst_163 = arith.constant 3.200000e+01 : f32
    %326 = vector.broadcast %cst_163 : f32 to vector<16x1xf32>
    %327 = arith.divf %325, %326 : vector<16x1xf32>
    %328 = vector.broadcast %327 : vector<16x1xf32> to vector<16x32xf32>
    %329 = arith.subf %319, %328 : vector<16x32xf32>
    %330 = arith.mulf %329, %329 : vector<16x32xf32>
    %cst_164 = arith.constant dense<0.000000e+00> : vector<16xf32>
    %331 = vector.multi_reduction <add>, %330, %cst_164 [1] : vector<16x32xf32> to vector<16xf32>
    %332 = vector.shape_cast %331 : vector<16xf32> to vector<16x1xf32>
    %cst_165 = arith.constant 3.200000e+01 : f32
    %333 = vector.broadcast %cst_165 : f32 to vector<16x1xf32>
    %334 = arith.divf %332, %333 : vector<16x1xf32>
    %cst_166 = arith.constant 9.99999996E-13 : f32
    %335 = vector.broadcast %cst_166 : f32 to vector<16x1xf32>
    %336 = arith.addf %334, %335 : vector<16x1xf32>
    %337 = math.rsqrt %336 : vector<16x1xf32>
    %338 = vector.broadcast %337 : vector<16x1xf32> to vector<16x32xf32>
    %339 = arith.mulf %329, %338 : vector<16x32xf32>
    %340 = vector.broadcast %321 : vector<1x32xf32> to vector<16x32xf32>
    %341 = arith.mulf %339, %340 : vector<16x32xf32>
    %342 = vector.broadcast %323 : vector<1x32xf32> to vector<16x32xf32>
    %343 = arith.addf %341, %342 : vector<16x32xf32>
    %344 = vector.extract_strided_slice %343 {offsets = [0, 0], sizes = [1, 32], strides = [1, 1]} : vector<16x32xf32> to vector<1x32xf32>
    %345 = vector.extract_strided_slice %343 {offsets = [8, 0], sizes = [1, 32], strides = [1, 1]} : vector<16x32xf32> to vector<1x32xf32>
    %346 = tpu.concatenate %344, %345 in 0 : vector<1x32xf32>, vector<1x32xf32> -> vector<2x32xf32>
    %c0_167 = arith.constant 0 : index
    %c0_168 = arith.constant 0 : index
    %347 = vector.load %arg15[%c0_167, %c0_168] : memref<32x32xf32, #tpu.memory_space<vmem>>, vector<32x32xf32>
    %cst_169 = arith.constant dense<0.000000e+00> : vector<2x32xf32>
    %348 = tpu.matmul %346, %347, %cst_169 {dimension_numbers = #tpu.dot_dimension_numbers<[1], [0], [0], [1], [0, 0, 1, 1], [], []>} : vector<2x32xf32>, vector<32x32xf32>, vector<2x32xf32> -> vector<2x32xf32>
    %c0_170 = arith.constant 0 : index
    %c0_171 = arith.constant 0 : index
    %349 = vector.load %arg16[%c0_170, %c0_171] : memref<1x32xf32, #tpu.memory_space<vmem>>, vector<1x32xf32>
    %350 = vector.broadcast %349 : vector<1x32xf32> to vector<2x32xf32>
    %351 = arith.addf %348, %350 : vector<2x32xf32>
    %352 = math.tanh %351 : vector<2x32xf32>
    %c0_172 = arith.constant 0 : index
    %c0_173 = arith.constant 0 : index
    %353 = vector.load %arg17[%c0_172, %c0_173] : memref<32x3xf32, #tpu.memory_space<vmem>>, vector<32x3xf32>
    %cst_174 = arith.constant dense<0.000000e+00> : vector<2x3xf32>
    %354 = tpu.matmul %352, %353, %cst_174 {dimension_numbers = #tpu.dot_dimension_numbers<[1], [0], [0], [1], [0, 0, 1, 1], [], []>} : vector<2x32xf32>, vector<32x3xf32>, vector<2x3xf32> -> vector<2x3xf32>
    %c0_175 = arith.constant 0 : index
    %c0_176 = arith.constant 0 : index
    %355 = vector.load %arg18[%c0_175, %c0_176] : memref<1x3xf32, #tpu.memory_space<vmem>>, vector<1x3xf32>
    %356 = vector.broadcast %355 : vector<1x3xf32> to vector<2x3xf32>
    %357 = arith.addf %354, %356 : vector<2x3xf32>
    %c0_177 = arith.constant 0 : index
    %c0_178 = arith.constant 0 : index
    %c0_179 = arith.constant 0 : index
    %358 = vector.load %arg19[%c0_177, %c0_178, %c0_179] : memref<2x1x3xf32, #tpu.memory_space<vmem>>, vector<2x1x3xf32>
    %359 = vector.shape_cast %358 : vector<2x1x3xf32> to vector<2x3xf32>
    %360 = vector.shape_cast %357 : vector<2x3xf32> to vector<2x1x3xf32>
    tpu.vector_store %arg19[%c0_177, %c0_178, %c0_179], %360 {strides = array<i32>} : memref<2x1x3xf32, #tpu.memory_space<vmem>>, vector<2x1x3xf32>,
    return
  }
}

</mosaic_0001>

<bundles_post_ra>
// kernel: simple_bert_forward.1
= control target key start
LH: loop header
LB: loop body
LE: loop exit
PB: predicated region body
PF: predicated region fallthrough
CT: control target
= control target key end

     0   :  { %s3783_s0 = inlined_call_operand.vmem [shape: f32[2,8,32], index: 0, kind: input, shape index: {}]   ;;  %s3784_s1 = inlined_call_operand.vmem [shape: f32[1,32], index: 1, kind: input, shape index: {}]   ;;  %s3785_s2 = inlined_call_operand.vmem [shape: f32[1,32], index: 2, kind: input, shape index: {}]   ;;  %s3786_s3 = inlined_call_operand.vmem [shape: f32[2,32,96], index: 3, kind: input, shape index: {}]   ;;  %s3787_s4 = inlined_call_operand.vmem [shape: f32[2,1,96], index: 4, kind: input, shape index: {}]   ;;  %s3788_s5 = inlined_call_operand.vmem [shape: f32[2,32,32], index: 5, kind: input, shape index: {}]   ;;  %s3789_s6 = inlined_call_operand.vmem [shape: f32[2,1,32], index: 6, kind: input, shape index: {}]   ;;  %s3790_s7 = inlined_call_operand.vmem [shape: f32[2,1,32], index: 7, kind: input, shape index: {}]   ;;  %s3791_s8 = inlined_call_operand.vmem [shape: f32[2,1,32], index: 8, kind: input, shape index: {}]   ;;  %s3792_s9 = inlined_call_operand.vmem [shape: f32[2,32,64], index: 9, kind: input, shape index: {}]   ;;  %s3793_s10 = inlined_call_operand.vmem [shape: f32[2,1,64], index: 10, kind: input, shape index: {}]   ;;  %s3794_s11 = inlined_call_operand.vmem [shape: f32[2,64,32], index: 11, kind: input, shape index: {}]   ;;  %s3795_s12 = inlined_call_operand.vmem [shape: f32[2,1,32], index: 12, kind: input, shape index: {}]   ;;  %s3796_s13 = inlined_call_operand.vmem [shape: f32[2,1,32], index: 13, kind: input, shape index: {}]   ;;  %s3797_s14 = inlined_call_operand.vmem [shape: f32[2,1,32], index: 14, kind: input, shape index: {}]   ;;  %s3798_s15 = inlined_call_operand.vmem [shape: f32[32,32], index: 15, kind: input, shape index: {}]   ;;  %s3799_s16 = inlined_call_operand.vmem [shape: f32[1,32], index: 16, kind: input, shape index: {}]   ;;  %s3800_s17 = inlined_call_operand.vmem [shape: f32[32,3], index: 17, kind: input, shape index: {}]   ;;  %s3801_s18 = inlined_call_operand.vmem [shape: f32[1,3], index: 18, kind: input, shape index: {}]   ;;  %s3802_s19 = inlined_call_operand.hbm [shape: f32[2,1,3], index: 19, kind: output, shape index: {}]  }
   0x1   :  { %3809 = sst [smem:[#allocation6_spill]] %s3783_s0 }
   0x2   :  { %3810 = sst [smem:[#allocation7_spill]] %s3784_s1 }
   0x3   :  { %3811 = sst [smem:[#allocation8_spill]] %s3785_s2 }
   0x4   :  { %3812 = sst [smem:[#allocation9_spill]] %s3786_s3 }
   0x5   :  { %s3813_s20 = sld [smem:[#allocation6_spill]]  ;;  %vm67_vm0 = vcmask 261120  }
   0xb   :  { %v63_v0 = vld [vmem:[%s3813_s20] sm:$0xff]  ;;  %v64_v1 = vld [vmem:[%s3813_s20 + $0x8] sm:$0xff] }
   0xc   :  { %24 = vsyncpa [#allocation4], 0  ;;  %v68_v2 = vsel %vm67_vm0, %v63_v0, 0.0  ;;  %v71_v3 = vsel %vm67_vm0, %v64_v1, 0.0  ;;  %s3814_s23 = sld [smem:[#allocation9_spill]]  ;;  %s3815_s30 = sld [smem:[#allocation7_spill]] }
   0xd   :  { %69 = vadd.xlane.f32.xlu0 %v68_v2  ;;  %s3816_s1 = sld [smem:[#allocation8_spill]]  ;;  %v3237_v36 = vmov 0.0   ;;  %vm3238_vm1 = vmmov 0   ;;  %v2655_v37 = vld [vmem:[%s3787_s4] ss:$0 sm:$0xff]  ;;  %s3239_s24 = smov 80  }
   0xe   :  { %2852 = vmatprep.subr.mxu1 %v3237_v36  ;;  %2854 = vmatprep.mubr.msk.f32.mxu1 %vm3238_vm1, %v3237_v36  ;;  %s3240_s25 = smov 96   ;;  %s3241_s3 = smov 112   ;;  %vm206_vm2 = vcmask 130048   ;;  %vm281_vm3 = vcmask 64512   ;;  %vm539_vm4 = vcmask 261248   ;;  %vm1141_vm5 = vcmask 523264  }
   0xf   :  { %s3242_s26 = smov 48   ;;  %s3807_s27 = smov 64   ;;  %vm2438_vm6 = vcmask 1040384   ;;  %vm2634_vm7 = vcmask 16384  }
  0x10   :  { %s3805_s28 = smov 16  }
  0x11   :  { %72 = vadd.xlane.f32.xlu0 %v71_v3 }
  0x12   :  { %v111_v14 = vld [vmem:[%s3814_s23] sm:$0xff]  ;;  %v112_v15 = vld [vmem:[%s3814_s23 + $0x8] sm:$0xff]  ;;  %v113_v16 = vld [vmem:[%s3814_s23 + $0x10] sm:$0xff] }
  0x13   :  { %v3047_v17 = vpack.c.bf16 %v112_v15, %v111_v14  ;;  %v114_v18 = vld [vmem:[%s3814_s23 + $0x18] sm:$0xff]  ;;  %v2653_v27 = vld [vmem:[%s3815_s30] ss:$0 sm:$0xff] }
  0x14   :  { %v3051_v19 = vpack.c.bf16 %v114_v18, %v113_v16  ;;  %v2654_v29 = vld [vmem:[%s3816_s1] ss:$0 sm:$0xff] }
  0x15   :  { %3048 = vmatprep.subr.bf16.mxu0 %v3047_v17 }
  0x16   :  { %3050 = vmatpush3.bf16.msra.mxu0 %v3047_v17 }
  0x17   :  { %3052 = vmatprep.subr.bf16.mxu0 %v3051_v19 }
  0x1a   :  { %3054 = vmatpush3.bf16.msra.mxu0 %v3051_v19 }
  0x1b   :  { %2862 = vmatprep.subr.mxu0 %v3237_v36 }
  0x9a   :  { %v70_v4 = vpop.xlane.xlu0 %69 }
  0x9b   :  { %v75_v5 = vmul.f32 0.03125, %v70_v4 }
  0x9d   :  { %v77_v6 = vsub.f32 %v63_v0, %v75_v5 }
  0x9e   :  { %v73_v7 = vpop.xlane.xlu0 %72 }
  0x9f   :  { %v76_v8 = vmul.f32 0.03125, %v73_v7  ;;  %v79_v9 = vmul.f32 %v77_v6, %v77_v6 }
  0xa1   :  { %v78_v10 = vsub.f32 %v64_v1, %v76_v8  ;;  %v81_v11 = vsel %vm67_vm0, %v79_v9, 0.0 }
  0xa2   :  { %82 = vadd.xlane.f32.xlu1 %v81_v11 }
  0xa3   :  { %v80_v12 = vmul.f32 %v78_v10, %v78_v10 }
  0xa5   :  { %v84_v13 = vsel %vm67_vm0, %v80_v12, 0.0 }
  0xa6   :  { %85 = vadd.xlane.f32.xlu1 %v84_v13 }
 0x12f   :  { %v83_v20 = vpop.xlane.xlu1 %82 }
 0x130   :  { %v87_v21 = vmul.f32 0.03125, %v83_v20 }
 0x132   :  { %v89_v22 = vadd.f32 1e-12, %v87_v21 }
 0x133   :  { %v86_v23 = vpop.xlane.xlu1 %85 }
 0x134   :  { %3151 = vrsqrt.f32 %v89_v22  ;;  %v88_v24 = vmul.f32 0.03125, %v86_v23 }
 0x136   :  { %v90_v25 = vadd.f32 1e-12, %v88_v24 }
 0x138   :  { %3153 = vrsqrt.f32 %v90_v25 }
 0x13e   :  { %v3152_v26 = vpop.eup %3151 }
 0x13f   :  { %v93_v28 = vmul.f32 %v3152_v26, %v77_v6 }
 0x141   :  { %v101_v30 = vmul.f32 %v2653_v27, %v93_v28 }
 0x142   :  { %v3154_v31 = vpop.eup %3153 }
 0x143   :  { %v94_v32 = vmul.f32 %v3154_v31, %v78_v10  ;;  %v3377_v33 = vadd.f32 %v2654_v29, %v101_v30 }
 0x145   :  { %v102_v34 = vmul.f32 %v2653_v27, %v94_v32  ;;  %2849 = vmatprep.mubr.msk.f32.mxu0 %vm67_vm0, %v3377_v33 }
 0x147   :  { %v3381_v35 = vadd.f32 %v2654_v29, %v102_v34 }
 0x149   :  { %2850 = vmatmul.mubr.msk.f32.vlgmr.msra.gmra.mrb[0].mxu0 %vm67_vm0, %v3381_v35 }
 0x14a   :  { %2864 = vmatprep.mubr.msk.f32.mxu0 %vm3238_vm1, %v3237_v36 }
 0x21c   :  { %v2851_v38 = vpop.f32.mrb[0].mxu0 }
 0x21d   :  { %v194_v39 = vpop.f32.mrb[1].mxu0  ;;  %v3400_v41 = vadd.f32 %v2851_v38, %v2655_v37 }
 0x21e   :  { %v3394_v40 = vadd.f32 %v2655_v37, %v194_v39 }
 0x220   :  { %372 = vrot.lane.b32.xlu1 %v3394_v40, %s3239_s24  ;;  %204 = vrot.lane.b32.xlu0 %v3394_v40, %s3240_s25 }
 0x224   :  { %370 = vrot.lane.b32.xlu1 %v3394_v40, %s3241_s3  ;;  %708 = vrot.lane.b32.xlu0 %v3400_v41, %s3239_s24 }
 0x228   :  { %542 = vrot.lane.b32.xlu1 %v3400_v41, %s3240_s25 }
 0x22c   :  { %706 = vrot.lane.b32.xlu1 %v3400_v41, %s3241_s3 }
 0x292   :  { %v373_v42 = vpop.permute.xlu1 %372  ;;  %v205_v43 = vpop.permute.xlu0 %204 }
 0x293   :  { %2853 = vmatpush3.xpose.msk.msra.mxu1 %vm206_vm2, %v205_v43  ;;  %2863 = vmatpush3.xpose.msk.msra.mxu0 %vm206_vm2, %v373_v42  ;;  %v879_v42 = vld [vmem:[%s3788_s5 + $0x8] sm:$0xff] }
 0x294   :  { %2872 = vmatprep.subr.mxu0 %v3237_v36  ;;  %2857 = vmatprep.subr.mxu1 %v3237_v36 }
 0x296   :  { %v371_v44 = vpop.permute.xlu1 %370  ;;  %2855 = vmatmul.mubr.msk.f32.vlgmr.msra.gmra.mrb[0].mxu1 %vm206_vm2, %v3394_v40  ;;  %v709_v46 = vpop.permute.xlu0 %708 }
 0x297   :  { %2865 = vmatmul.mubr.msk.f32.vlgmr.msra.gmra.mrb[2].mxu0 %vm206_vm2, %v371_v44  ;;  %2859 = vmatprep.mubr.msk.f32.mxu1 %vm3238_vm1, %v3237_v36  ;;  %v880_v44 = vld [vmem:[%s3788_s5 + $0x10] sm:$0xff] }
 0x298   :  { %2874 = vmatprep.mubr.msk.f32.mxu0 %vm3238_vm1, %v3237_v36 }
 0x29a   :  { %v543_v45 = vpop.permute.xlu1 %542 }
 0x29b   :  { %2873 = vmatpush3.xpose.msk.msra.mxu0 %vm206_vm2, %v543_v45  ;;  %v881_v45 = vld [vmem:[%s3788_s5 + $0x18] sm:$0xff] }
 0x29c   :  { %2882 = vmatprep.subr.mxu0 %v3237_v36 }
 0x29e   :  { %2875 = vmatmul.mubr.msk.f32.vlgmr.msra.gmra.mrb[4].mxu0 %vm206_vm2, %v3400_v41  ;;  %v707_v47 = vpop.permute.xlu1 %706 }
 0x29f   :  { %2883 = vmatpush3.xpose.msk.msra.mxu0 %vm206_vm2, %v709_v46  ;;  %2884 = vmatprep.mubr.msk.f32.mxu0 %vm3238_vm1, %v3237_v36  ;;  %v3059_v46 = vpack.c.bf16 %v881_v45, %v880_v44 }
 0x2a2   :  { %2885 = vmatmul.mubr.msk.f32.vlgmr.msra.gmra.mrb[6].mxu0 %vm206_vm2, %v707_v47 }
 0x369   :  { %v277_v48 = vpop.f32.mrb[0].mxu1 }
 0x36a   :  { %v2856_v49 = vpop.f32.mrb[1].mxu1  ;;  %v444_v50 = vpop.f32.mrb[2].mxu0  ;;  %v282_v51 = vsel %vm281_vm3, %v277_v48, -inf }
 0x36b   :  { %v2866_v52 = vpop.f32.mrb[3].mxu0  ;;  %283 = vmax.xlane.f32.xlu0 %v282_v51  ;;  %v448_v53 = vsel %vm281_vm3, %v444_v50, -inf }
 0x36c   :  { %449 = vmax.xlane.f32.xlu1 %v448_v53  ;;  %v2670_v53 = vld [vmem:[%s3789_s6] ss:$0 sm:$0xff] }
 0x371   :  { %v614_v54 = vpop.f32.mrb[4].mxu0 }
 0x372   :  { %v2876_v55 = vpop.f32.mrb[5].mxu0  ;;  %v618_v56 = vsel %vm281_vm3, %v614_v54, -inf }
 0x373   :  { %619 = vmax.xlane.f32.xlu0 %v618_v56 }
 0x375   :  { %v780_v57 = vpop.f32.mrb[6].mxu0 }
 0x376   :  { %v2886_v58 = vpop.f32.mrb[7].mxu0  ;;  %v784_v59 = vsel %vm281_vm3, %v780_v57, -inf }
 0x377   :  { %785 = vmax.xlane.f32.xlu0 %v784_v59 }
 0x3f8   :  { %v284_v60 = vpop.xlane.xlu0 %283 }
 0x3f9   :  { %v285_v61 = vsub.f32 %v277_v48, %v284_v60  ;;  %v450_v62 = vpop.xlane.xlu1 %449 }
 0x3fa   :  { %v451_v63 = vsub.f32 %v444_v50, %v450_v62 }
 0x3fb   :  { %v286_v0 = vmul.f32 1.442695, %v285_v61 }
 0x3fc   :  { %v452_v1 = vmul.f32 1.442695, %v451_v63 }
 0x3fd   :  { %3155 = vpow2.f32 %v286_v0 }
 0x3fe   :  { %3157 = vpow2.f32 %v452_v1 }
 0x400   :  { %v620_v2 = vpop.xlane.xlu0 %619 }
 0x401   :  { %v621_v3 = vsub.f32 %v614_v54, %v620_v2 }
 0x403   :  { %v622_v4 = vmul.f32 1.442695, %v621_v3 }
 0x404   :  { %v786_v11 = vpop.xlane.xlu0 %785 }
 0x405   :  { %3159 = vpow2.f32 %v622_v4  ;;  %v787_v12 = vsub.f32 %v780_v57, %v786_v11 }
 0x407   :  { %v3156_v5 = vpop.eup %3155  ;;  %v788_v13 = vmul.f32 1.442695, %v787_v12 }
 0x408   :  { %v3158_v6 = vpop.eup %3157  ;;  %v288_v7 = vsel %vm281_vm3, %v3156_v5, 0.0 }
 0x409   :  { %289 = vadd.xlane.f32.xlu0 %v288_v7  ;;  %v454_v8 = vsel %vm281_vm3, %v3158_v6, 0.0  ;;  %3161 = vpow2.f32 %v788_v13  ;;  %v1017_v7 = vld [vmem:[%s3792_s9 + $0x8] sm:$0xff] }
 0x40a   :  { %455 = vadd.xlane.f32.xlu1 %v454_v8 }
 0x40f   :  { %v3160_v9 = vpop.eup %3159 }
 0x410   :  { %v624_v10 = vsel %vm281_vm3, %v3160_v9, 0.0 }
 0x411   :  { %625 = vadd.xlane.f32.xlu0 %v624_v10  ;;  %v1019_v10 = vld [vmem:[%s3792_s9 + $0x18] sm:$0xff] }
 0x413   :  { %v3162_v14 = vpop.eup %3161 }
 0x414   :  { %v790_v15 = vsel %vm281_vm3, %v3162_v14, 0.0 }
 0x41b   :  { %459 = vrot.lane.b32.xlu1 %v3394_v40, %s3242_s26 }
 0x41f   :  { %629 = vrot.lane.b32.xlu1 %v3400_v41, %s3807_s27 }
 0x427   :  { %293 = vrot.lane.b32.xlu0 %v3394_v40, %s3807_s27 }
 0x443   :  { %791 = vadd.xlane.f32.xlu1 %v790_v15 }
 0x454   :  { %795 = vrot.lane.b32.xlu1 %v3400_v41, %s3242_s26  ;;  %v878_v41 = vld [vmem:[%s3788_s5] sm:$0xff] }
 0x455   :  { %v3055_v43 = vpack.c.bf16 %v879_v42, %v878_v41  ;;  %v1133_v41 = vld [vmem:[%s3794_s11 + $0x38] sm:$0xff] }
 0x457   :  { %3056 = vmatprep.subr.bf16.mxu0 %v3055_v43 }
 0x458   :  { %3058 = vmatpush3.bf16.msra.mxu0 %v3055_v43  ;;  %v2675_v43 = vld [vmem:[%s3793_s10] ss:$0 sm:$0xff] }
 0x459   :  { %3060 = vmatprep.subr.bf16.mxu0 %v3059_v46 }
 0x45c   :  { %3062 = vmatpush3.bf16.msra.mxu0 %v3059_v46 }
 0x496   :  { %v290_v16 = vpop.xlane.xlu0 %289 }
 0x497   :  { %3163 = vrcp.f32 %v290_v16  ;;  %v456_v17 = vpop.xlane.xlu1 %455 }
 0x498   :  { %3165 = vrcp.f32 %v456_v17 }
 0x49b   :  { %v460_v21 = vpop.permute.xlu1 %459 }
 0x49e   :  { %v626_v18 = vpop.xlane.xlu0 %625 }
 0x49f   :  { %3167 = vrcp.f32 %v626_v18  ;;  %v630_v25 = vpop.permute.xlu1 %629 }
 0x4a1   :  { %v3164_v19 = vpop.eup %3163 }
 0x4a2   :  { %v292_v20 = vmul.f32 %v3164_v19, %v3156_v5  ;;  %v294_v22 = vpop.permute.xlu0 %293  ;;  %v3166_v23 = vpop.eup %3165  ;;  %v2673_v19 = vld [vmem:[%s3790_s7] ss:$0 sm:$0xff] }
 0x4a3   :  { %2858 = vmatpush3.msra.mxu1 %v294_v22  ;;  %v458_v24 = vmul.f32 %v3166_v23, %v3158_v6 }
 0x4a4   :  { %2860 = vmatmul.mubr.msk.f32.vlgmr.msra.gmra.mrb[2].mxu1 %vm281_vm3, %v292_v20  ;;  %2867 = vmatprep.subr.mxu1 %v3237_v36 }
 0x4a5   :  { %2868 = vmatpush3.msra.mxu1 %v460_v21  ;;  %2869 = vmatprep.mubr.msk.f32.mxu1 %vm3238_vm1, %v3237_v36  ;;  %v2674_v21 = vld [vmem:[%s3791_s8] ss:$0 sm:$0xff] }
 0x4a6   :  { %2877 = vmatprep.subr.mxu1 %v3237_v36 }
 0x4a8   :  { %2870 = vmatmul.mubr.msk.f32.vlgmr.msra.gmra.mrb[4].mxu1 %vm281_vm3, %v458_v24 }
 0x4a9   :  { %v3168_v26 = vpop.eup %3167  ;;  %2878 = vmatpush3.msra.mxu1 %v630_v25  ;;  %2879 = vmatprep.mubr.msk.f32.mxu1 %vm3238_vm1, %v3237_v36 }
 0x4aa   :  { %v628_v27 = vmul.f32 %v3168_v26, %v3160_v9  ;;  %2887 = vmatprep.subr.mxu1 %v3237_v36  ;;  %v1018_v9 = vld [vmem:[%s3792_s9 + $0x10] sm:$0xff] }
 0x4ab   :  { %v3067_v11 = vpack.c.bf16 %v1019_v10, %v1018_v9 }
 0x4ac   :  { %2880 = vmatmul.mubr.msk.f32.vlgmr.msra.gmra.mrb[6].mxu1 %vm281_vm3, %v628_v27 }
 0x4ad   :  { %2889 = vmatprep.mubr.msk.f32.mxu1 %vm3238_vm1, %v3237_v36 }
 0x4d0   :  { %v792_v28 = vpop.xlane.xlu1 %791 }
 0x4d1   :  { %3169 = vrcp.f32 %v792_v28  ;;  %v1126_v28 = vld [vmem:[%s3794_s11] sm:$0xff] }
 0x4d4   :  { %v796_v29 = vpop.permute.xlu1 %795 }
 0x4d5   :  { %2888 = vmatpush3.msra.mxu1 %v796_v29  ;;  %v1127_v29 = vld [vmem:[%s3794_s11 + $0x8] sm:$0xff] }
 0x4db   :  { %v3170_v30 = vpop.eup %3169 }
 0x4dc   :  { %v794_v31 = vmul.f32 %v3170_v30, %v3162_v14  ;;  %v3071_v30 = vpack.c.bf16 %v1127_v29, %v1126_v28 }
 0x4de   :  { %2890 = vmatmul.mubr.msk.f32.vlgmr.msra.gmra.mrb[8].mxu1 %vm281_vm3, %v794_v31  ;;  %v1128_v31 = vld [vmem:[%s3794_s11 + $0x10] sm:$0xff]  ;;  %3072 = vmatprep.subr.bf16.mxu0 %v3071_v30 }
 0x577   :  { %v365_v32 = vpop.f32.mrb[2].mxu1 }
 0x578   :  { %369 = vst.msk [vmem:[#allocation2] sm:$0xff] %vm206_vm2, %v365_v32  ;;  %v2861_v34 = vpop.f32.mrb[3].mxu1  ;;  %v1129_v32 = vld [vmem:[%s3794_s11 + $0x18] sm:$0xff] }
 0x579   :  { %v3075_v34 = vpack.c.bf16 %v1129_v32, %v1128_v31  ;;  %v2681_v32 = vld [vmem:[%s3796_s13] ss:$0 sm:$0xff] }
 0x57b   :  { %v531_v37 = vpop.f32.mrb[4].mxu1 }
 0x57c   :  { %536 = vrot.lane.b32.xlu0 %v531_v37, %s3805_s28  ;;  %v2871_v38 = vpop.f32.mrb[5].mxu1  ;;  %v1130_v37 = vld [vmem:[%s3794_s11 + $0x20] sm:$0xff] }
 0x57d   :  { %v1131_v38 = vld [vmem:[%s3794_s11 + $0x28] sm:$0xff] }
 0x57f   :  { %v701_v39 = vpop.f32.mrb[6].mxu1 }
 0x580   :  { %705 = vst.msk [vmem:[#allocation2 + $0x8] sm:$0xff] %vm206_vm2, %v701_v39  ;;  %v2881_v40 = vpop.f32.mrb[7].mxu1  ;;  %v3079_v39 = vpack.c.bf16 %v1131_v38, %v1130_v37 }
 0x581   :  { %v1132_v40 = vld [vmem:[%s3794_s11 + $0x30] sm:$0xff] }
 0x582   :  { %v3083_v42 = vpack.c.bf16 %v1133_v41, %v1132_v40 }
 0x5b1   :  { %v867_v47 = vpop.f32.mrb[8].mxu1 }
 0x5b2   :  { %872 = vrot.lane.b32.xlu1 %v867_v47, %s3805_s28  ;;  %v2891_v48 = vpop.f32.mrb[9].mxu1 }
 0x5ee   :  { %v537_v49 = vpop.permute.xlu0 %536 }
 0x5ef   :  { %540 = vst.msk [vmem:[#allocation2] sm:$0xff] %vm539_vm4, %v537_v49 }
 0x5f6   :  { %v876_v50 = vld [vmem:[#allocation2] sm:$0xff] }
 0x5f7   :  { %2900 = vmatprep.mubr.msk.f32.mxu0 %vm67_vm0, %v876_v50 }
 0x624   :  { %v873_v51 = vpop.permute.xlu1 %872 }
 0x625   :  { %875 = vst.msk [vmem:[#allocation2 + $0x8] sm:$0xff] %vm539_vm4, %v873_v51 }
 0x62c   :  { %v877_v52 = vld [vmem:[#allocation2 + $0x8] sm:$0xff] }
 0x62d   :  { %2901 = vmatmul.mubr.msk.f32.vlgmr.msra.gmra.mrb[8].mxu0 %vm67_vm0, %v877_v52 }
 0x62e   :  { %3074 = vmatpush3.bf16.msra.mxu0 %v3071_v30 }
 0x62f   :  { %3076 = vmatprep.subr.bf16.mxu0 %v3075_v34 }
 0x632   :  { %3078 = vmatpush3.bf16.msra.mxu0 %v3075_v34 }
 0x633   :  { %3080 = vmatprep.subr.bf16.mxu0 %v3079_v39 }
 0x636   :  { %3082 = vmatpush3.bf16.msra.mxu0 %v3079_v39  ;;  %v2682_v39 = vld [vmem:[%s3797_s14] ss:$0 sm:$0xff] }
 0x637   :  { %3084 = vmatprep.subr.bf16.mxu0 %v3083_v42 }
 0x63a   :  { %3086 = vmatpush3.bf16.msra.mxu0 %v3083_v42 }
 0x63b   :  { %2954 = vmatprep.subr.mxu0 %v3237_v36 }
 0x700   :  { %v2902_v54 = vpop.f32.mrb[8].mxu0 }
 0x701   :  { %v967_v55 = vadd.f32 %v2902_v54, %v2670_v53  ;;  %v961_v56 = vpop.f32.mrb[9].mxu0 }
 0x702   :  { %v962_v57 = vadd.f32 %v2670_v53, %v961_v56 }
 0x703   :  { %v971_v58 = vadd.f32 %v967_v55, %v3381_v35 }
 0x704   :  { %v970_v59 = vadd.f32 %v962_v57, %v3377_v33  ;;  %v1016_v33 = vld [vmem:[%s3792_s9] sm:$0xff] }
 0x705   :  { %v977_v60 = vsel %vm67_vm0, %v971_v58, 0.0  ;;  %v3063_v8 = vpack.c.bf16 %v1017_v7, %v1016_v33 }
 0x706   :  { %978 = vadd.xlane.f32.xlu1 %v977_v60  ;;  %v974_v61 = vsel %vm67_vm0, %v970_v59, 0.0 }
 0x707   :  { %975 = vadd.xlane.f32.xlu0 %v974_v61  ;;  %3064 = vmatprep.subr.bf16.mxu1 %v3063_v8 }
 0x708   :  { %3066 = vmatpush3.bf16.msra.mxu1 %v3063_v8 }
 0x709   :  { %3068 = vmatprep.subr.bf16.mxu1 %v3067_v11 }
 0x70c   :  { %3070 = vmatpush3.bf16.msra.mxu1 %v3067_v11 }
 0x793   :  { %v979_v62 = vpop.xlane.xlu1 %978 }
 0x794   :  { %v981_v63 = vmul.f32 0.03125, %v979_v62  ;;  %v976_v0 = vpop.xlane.xlu0 %975 }
 0x795   :  { %v980_v1 = vmul.f32 0.03125, %v976_v0 }
 0x796   :  { %v983_v2 = vsub.f32 %v971_v58, %v981_v63 }
 0x797   :  { %v982_v3 = vsub.f32 %v970_v59, %v980_v1 }
 0x798   :  { %v985_v6 = vmul.f32 %v983_v2, %v983_v2 }
 0x799   :  { %v984_v4 = vmul.f32 %v982_v3, %v982_v3 }
 0x79a   :  { %v989_v35 = vsel %vm67_vm0, %v985_v6, 0.0 }
 0x79b   :  { %v986_v5 = vsel %vm67_vm0, %v984_v4, 0.0 }
 0x79c   :  { %987 = vadd.xlane.f32.xlu0 %v986_v5 }
 0x7a0   :  { %990 = vadd.xlane.f32.xlu0 %v989_v35 }
 0x829   :  { %v988_v12 = vpop.xlane.xlu0 %987 }
 0x82a   :  { %v992_v13 = vmul.f32 0.03125, %v988_v12 }
 0x82c   :  { %v994_v14 = vadd.f32 1e-12, %v992_v13 }
 0x82d   :  { %v991_v15 = vpop.xlane.xlu0 %990 }
 0x82e   :  { %3171 = vrsqrt.f32 %v994_v14  ;;  %v993_v16 = vmul.f32 0.03125, %v991_v15 }
 0x830   :  { %v995_v17 = vadd.f32 1e-12, %v993_v16 }
 0x832   :  { %3173 = vrsqrt.f32 %v995_v17 }
 0x838   :  { %v3172_v18 = vpop.eup %3171 }
 0x839   :  { %v998_v20 = vmul.f32 %v3172_v18, %v982_v3 }
 0x83b   :  { %v1006_v22 = vmul.f32 %v2673_v19, %v998_v20  ;;  %v2684_v20 = vld [vmem:[%s3814_s23 + $0x28] sm:$0xff] }
 0x83c   :  { %v3174_v23 = vpop.eup %3173 }
 0x83d   :  { %v999_v24 = vmul.f32 %v3174_v23, %v983_v2  ;;  %v1014_v25 = vadd.f32 %v2674_v21, %v1006_v22  ;;  %v2678_v2 = vld [vmem:[%s3795_s12] ss:$0 sm:$0xff]  ;;  %v2685_v22 = vld [vmem:[%s3814_s23 + $0x30] sm:$0xff]  ;;  %v2686_v23 = vld [vmem:[%s3814_s23 + $0x38] sm:$0xff] }
 0x83f   :  { %v1007_v26 = vmul.f32 %v2673_v19, %v999_v24  ;;  %2911 = vmatprep.mubr.msk.f32.mxu1 %vm67_vm0, %v1014_v25  ;;  %v2683_v19 = vld [vmem:[%s3814_s23 + $0x20] sm:$0xff]  ;;  %v3091_v24 = vpack.c.bf16 %v2686_v23, %v2685_v22 }
 0x841   :  { %v1015_v27 = vadd.f32 %v2674_v21, %v1007_v26  ;;  %v3087_v21 = vpack.c.bf16 %v2684_v20, %v2683_v19 }
 0x843   :  { %2912 = vmatmul.mubr.msk.f32.vlgmr.msra.gmra.mrb[10].mxu1 %vm67_vm0, %v1015_v27  ;;  %3088 = vmatprep.subr.bf16.mxu1 %v3087_v21 }
 0x844   :  { %3090 = vmatpush3.bf16.msra.mxu1 %v3087_v21 }
 0x845   :  { %3092 = vmatprep.subr.bf16.mxu1 %v3091_v24 }
 0x848   :  { %3094 = vmatpush3.bf16.msra.mxu1 %v3091_v24 }
 0x849   :  { %2944 = vmatprep.subr.mxu1 %v3237_v36 }
 0x916   :  { %v2913_v44 = vpop.f32.mrb[10].mxu1 }
 0x917   :  { %v1105_v45 = vadd.f32 %v2913_v44, %v2675_v43  ;;  %v1099_v46 = vpop.f32.mrb[11].mxu1  ;;  %v2688_v44 = vld [vmem:[%s3787_s4 + $0x1] ss:$0 sm:$0xff]  ;;  %s3817_s4 = smov 64  }
 0x918   :  { %v1100_v47 = vadd.f32 %v2675_v43, %v1099_v46 }
 0x919   :  { %v1111_v48 = vmul.f32 0.044715, %v1105_v45  ;;  %v1109_v63 = vmul.f32 0.5, %v1105_v45 }
 0x91a   :  { %v1110_v49 = vmul.f32 0.044715, %v1100_v47  ;;  %v1108_v61 = vmul.f32 0.5, %v1100_v47 }
 0x91b   :  { %v1113_v50 = vmul.f32 %v1111_v48, %v1105_v45 }
 0x91c   :  { %v1112_v51 = vmul.f32 %v1110_v49, %v1100_v47 }
 0x91d   :  { %v1115_v52 = vmul.f32 %v1113_v50, %v1105_v45 }
 0x91e   :  { %v1114_v53 = vmul.f32 %v1112_v51, %v1100_v47 }
 0x91f   :  { %v1117_v54 = vadd.f32 %v1115_v52, %v1105_v45 }
 0x920   :  { %v1116_v55 = vadd.f32 %v1114_v53, %v1100_v47 }
 0x921   :  { %v1119_v56 = vmul.f32 0.7978846, %v1117_v54 }
 0x922   :  { %v1118_v57 = vmul.f32 0.7978846, %v1116_v55 }
 0x923   :  { %3175 = vtanh.f32 %v1119_v56 }
 0x924   :  { %3177 = vtanh.f32 %v1118_v57 }
 0x92d   :  { %v3176_v58 = vpop.eup %3175 }
 0x92e   :  { %v3178_v59 = vpop.eup %3177  ;;  %v1123_v60 = vadd.f32 1.0, %v3176_v58 }
 0x92f   :  { %v1122_v62 = vadd.f32 1.0, %v3178_v59 }
 0x930   :  { %v1125_v1 = vmul.f32 %v1123_v60, %v1109_v63 }
 0x931   :  { %v1124_v0 = vmul.f32 %v1122_v62, %v1108_v61 }
 0x933   :  { %2930 = vmatprep.mubr.msk.f32.mxu0 %vm1141_vm5, %v1124_v0 }
 0x934   :  { %2931 = vmatmul.mubr.msk.f32.vlgmr.msra.gmra.mrb[10].mxu0 %vm1141_vm5, %v1125_v1 }
 0x935   :  { %2956 = vmatprep.mubr.msk.f32.mxu0 %vm3238_vm1, %v3237_v36 }
 0xa07   :  { %v2932_v3 = vpop.f32.mrb[10].mxu0 }
 0xa08   :  { %v1220_v4 = vadd.f32 %v2932_v3, %v2678_v2  ;;  %v1214_v5 = vpop.f32.mrb[11].mxu0 }
 0xa09   :  { %v1215_v6 = vadd.f32 %v2678_v2, %v1214_v5 }
 0xa0a   :  { %v1224_v35 = vadd.f32 %v1220_v4, %v1015_v27 }
 0xa0b   :  { %v1223_v33 = vadd.f32 %v1215_v6, %v1014_v25 }
 0xa0c   :  { %v1230_v7 = vsel %vm67_vm0, %v1224_v35, 0.0 }
 0xa0d   :  { %1231 = vadd.xlane.f32.xlu1 %v1230_v7  ;;  %v1227_v8 = vsel %vm67_vm0, %v1223_v33, 0.0 }
 0xa0e   :  { %1228 = vadd.xlane.f32.xlu0 %v1227_v8 }
 0xa9a   :  { %v1232_v9 = vpop.xlane.xlu1 %1231 }
 0xa9b   :  { %v1234_v10 = vmul.f32 0.03125, %v1232_v9  ;;  %v1229_v11 = vpop.xlane.xlu0 %1228 }
 0xa9c   :  { %v1233_v12 = vmul.f32 0.03125, %v1229_v11 }
 0xa9d   :  { %v1236_v13 = vsub.f32 %v1224_v35, %v1234_v10 }
 0xa9e   :  { %v1235_v14 = vsub.f32 %v1223_v33, %v1233_v12 }
 0xa9f   :  { %v1238_v15 = vmul.f32 %v1236_v13, %v1236_v13 }
 0xaa0   :  { %v1237_v16 = vmul.f32 %v1235_v14, %v1235_v14 }
 0xaa1   :  { %v1242_v17 = vsel %vm67_vm0, %v1238_v15, 0.0 }
 0xaa2   :  { %1243 = vadd.xlane.f32.xlu1 %v1242_v17  ;;  %v1239_v18 = vsel %vm67_vm0, %v1237_v16, 0.0 }
 0xaa3   :  { %1240 = vadd.xlane.f32.xlu0 %v1239_v18 }
 0xb2f   :  { %v1244_v25 = vpop.xlane.xlu1 %1243 }
 0xb30   :  { %v1246_v26 = vmul.f32 0.03125, %v1244_v25  ;;  %v1241_v27 = vpop.xlane.xlu0 %1240 }
 0xb31   :  { %v1245_v28 = vmul.f32 0.03125, %v1241_v27 }
 0xb32   :  { %v1248_v29 = vadd.f32 1e-12, %v1246_v26 }
 0xb33   :  { %v1247_v30 = vadd.f32 1e-12, %v1245_v28 }
 0xb34   :  { %3179 = vrsqrt.f32 %v1248_v29 }
 0xb35   :  { %3181 = vrsqrt.f32 %v1247_v30 }
 0xb3e   :  { %v3180_v31 = vpop.eup %3179 }
 0xb3f   :  { %v3182_v34 = vpop.eup %3181  ;;  %v1252_v37 = vmul.f32 %v3180_v31, %v1236_v13 }
 0xb40   :  { %v1251_v38 = vmul.f32 %v3182_v34, %v1235_v14 }
 0xb41   :  { %v1260_v40 = vmul.f32 %v2681_v32, %v1252_v37 }
 0xb42   :  { %v1259_v41 = vmul.f32 %v2681_v32, %v1251_v38 }
 0xb43   :  { %v3567_v43 = vadd.f32 %v2682_v39, %v1260_v40 }
 0xb44   :  { %v3565_v42 = vadd.f32 %v2682_v39, %v1259_v41 }
 0xb46   :  { %2941 = vmatprep.mubr.msk.f32.mxu1 %vm67_vm0, %v3565_v42 }
 0xb47   :  { %2942 = vmatmul.mubr.msk.f32.vlgmr.msra.gmra.mrb[12].mxu1 %vm67_vm0, %v3567_v43 }
 0xb48   :  { %2946 = vmatprep.mubr.msk.f32.mxu1 %vm3238_vm1, %v3237_v36 }
 0xc1a   :  { %v2943_v45 = vpop.f32.mrb[12].mxu1 }
 0xc1b   :  { %v1354_v46 = vpop.f32.mrb[13].mxu1  ;;  %v3584_v48 = vadd.f32 %v2943_v45, %v2688_v44 }
 0xc1c   :  { %v3578_v47 = vadd.f32 %v2688_v44, %v1354_v46 }
 0xc1e   :  { %1530 = vrot.lane.b32.xlu1 %v3578_v47, %s3239_s24  ;;  %1364 = vrot.lane.b32.xlu0 %v3578_v47, %s3240_s25 }
 0xc22   :  { %1528 = vrot.lane.b32.xlu1 %v3578_v47, %s3241_s3  ;;  %1865 = vrot.lane.b32.xlu0 %v3584_v48, %s3239_s24  ;;  %s3818_s24 = smov 16  }
 0xc26   :  { %1699 = vrot.lane.b32.xlu1 %v3584_v48, %s3240_s25 }
 0xc2a   :  { %1863 = vrot.lane.b32.xlu1 %v3584_v48, %s3241_s3 }
 0xc90   :  { %v1531_v49 = vpop.permute.xlu1 %1530  ;;  %v1365_v50 = vpop.permute.xlu0 %1364 }
 0xc91   :  { %2945 = vmatpush3.xpose.msk.msra.mxu1 %vm206_vm2, %v1365_v50  ;;  %2955 = vmatpush3.xpose.msk.msra.mxu0 %vm206_vm2, %v1531_v49  ;;  %v2704_v49 = vld [vmem:[%s3788_s5 + $0x28] sm:$0xff] }
 0xc92   :  { %2964 = vmatprep.subr.mxu0 %v3237_v36  ;;  %2949 = vmatprep.subr.mxu1 %v3237_v36 }
 0xc94   :  { %v1529_v51 = vpop.permute.xlu1 %1528  ;;  %2947 = vmatmul.mubr.msk.f32.vlgmr.msra.gmra.mrb[14].mxu1 %vm206_vm2, %v3578_v47  ;;  %v1866_v53 = vpop.permute.xlu0 %1865 }
 0xc95   :  { %2957 = vmatmul.mubr.msk.f32.vlgmr.msra.gmra.mrb[12].mxu0 %vm206_vm2, %v1529_v51  ;;  %2951 = vmatprep.mubr.msk.f32.mxu1 %vm3238_vm1, %v3237_v36  ;;  %v2705_v51 = vld [vmem:[%s3788_s5 + $0x30] sm:$0xff] }
 0xc96   :  { %2966 = vmatprep.mubr.msk.f32.mxu0 %vm3238_vm1, %v3237_v36 }
 0xc98   :  { %v1700_v52 = vpop.permute.xlu1 %1699 }
 0xc99   :  { %2965 = vmatpush3.xpose.msk.msra.mxu0 %vm206_vm2, %v1700_v52  ;;  %v2706_v52 = vld [vmem:[%s3788_s5 + $0x38] sm:$0xff] }
 0xc9a   :  { %2974 = vmatprep.subr.mxu0 %v3237_v36 }
 0xc9c   :  { %2967 = vmatmul.mubr.msk.f32.vlgmr.msra.gmra.mrb[14].mxu0 %vm206_vm2, %v3584_v48  ;;  %v1864_v54 = vpop.permute.xlu1 %1863 }
 0xc9d   :  { %2975 = vmatpush3.xpose.msk.msra.mxu0 %vm206_vm2, %v1866_v53  ;;  %2976 = vmatprep.mubr.msk.f32.mxu0 %vm3238_vm1, %v3237_v36  ;;  %v3099_v53 = vpack.c.bf16 %v2706_v52, %v2705_v51 }
 0xca0   :  { %2977 = vmatmul.mubr.msk.f32.vlgmr.msra.gmra.mrb[16].mxu0 %vm206_vm2, %v1864_v54 }
 0xd67   :  { %v1436_v55 = vpop.f32.mrb[14].mxu1 }
 0xd68   :  { %v2948_v56 = vpop.f32.mrb[15].mxu1  ;;  %v1602_v57 = vpop.f32.mrb[12].mxu0  ;;  %v1440_v58 = vsel %vm281_vm3, %v1436_v55, -inf }
 0xd69   :  { %v2958_v59 = vpop.f32.mrb[13].mxu0  ;;  %1441 = vmax.xlane.f32.xlu0 %v1440_v58  ;;  %v1606_v60 = vsel %vm281_vm3, %v1602_v57, -inf }
 0xd6a   :  { %1607 = vmax.xlane.f32.xlu1 %v1606_v60  ;;  %v2708_v60 = vld [vmem:[%s3789_s6 + $0x1] ss:$0 sm:$0xff] }
 0xd6f   :  { %v1771_v61 = vpop.f32.mrb[14].mxu0 }
 0xd70   :  { %v2968_v62 = vpop.f32.mrb[15].mxu0  ;;  %v1775_v63 = vsel %vm281_vm3, %v1771_v61, -inf }
 0xd71   :  { %1776 = vmax.xlane.f32.xlu0 %v1775_v63 }
 0xd73   :  { %v1937_v0 = vpop.f32.mrb[16].mxu0 }
 0xd74   :  { %v2978_v1 = vpop.f32.mrb[17].mxu0  ;;  %v1941_v2 = vsel %vm281_vm3, %v1937_v0, -inf }
 0xd75   :  { %1942 = vmax.xlane.f32.xlu0 %v1941_v2 }
 0xdf6   :  { %v1442_v3 = vpop.xlane.xlu0 %1441 }
 0xdf7   :  { %v1443_v4 = vsub.f32 %v1436_v55, %v1442_v3  ;;  %v1608_v5 = vpop.xlane.xlu1 %1607 }
 0xdf8   :  { %v1609_v6 = vsub.f32 %v1602_v57, %v1608_v5 }
 0xdf9   :  { %v1444_v35 = vmul.f32 1.442695, %v1443_v4 }
 0xdfa   :  { %v1610_v33 = vmul.f32 1.442695, %v1609_v6 }
 0xdfb   :  { %3183 = vpow2.f32 %v1444_v35 }
 0xdfc   :  { %3185 = vpow2.f32 %v1610_v33 }
 0xdfe   :  { %v1777_v7 = vpop.xlane.xlu0 %1776 }
 0xdff   :  { %v1778_v8 = vsub.f32 %v1771_v61, %v1777_v7 }
 0xe01   :  { %v1779_v9 = vmul.f32 1.442695, %v1778_v8 }
 0xe02   :  { %v1943_v16 = vpop.xlane.xlu0 %1942 }
 0xe03   :  { %3187 = vpow2.f32 %v1779_v9  ;;  %v1944_v17 = vsub.f32 %v1937_v0, %v1943_v16 }
 0xe05   :  { %v3184_v10 = vpop.eup %3183  ;;  %v1945_v18 = vmul.f32 1.442695, %v1944_v17 }
 0xe06   :  { %v3186_v11 = vpop.eup %3185  ;;  %v1446_v12 = vsel %vm281_vm3, %v3184_v10, 0.0 }
 0xe07   :  { %1447 = vadd.xlane.f32.xlu0 %v1446_v12  ;;  %v1612_v13 = vsel %vm281_vm3, %v3186_v11, 0.0  ;;  %3189 = vpow2.f32 %v1945_v18  ;;  %v2716_v12 = vld [vmem:[%s3792_s9 + $0x28] sm:$0xff] }
 0xe08   :  { %1613 = vadd.xlane.f32.xlu1 %v1612_v13 }
 0xe0d   :  { %v3188_v14 = vpop.eup %3187 }
 0xe0e   :  { %v1781_v15 = vsel %vm281_vm3, %v3188_v14, 0.0 }
 0xe0f   :  { %1782 = vadd.xlane.f32.xlu0 %v1781_v15  ;;  %v2718_v15 = vld [vmem:[%s3792_s9 + $0x38] sm:$0xff] }
 0xe11   :  { %v3190_v19 = vpop.eup %3189 }
 0xe12   :  { %v1947_v20 = vsel %vm281_vm3, %v3190_v19, 0.0 }
 0xe19   :  { %1617 = vrot.lane.b32.xlu1 %v3578_v47, %s3242_s26 }
 0xe1d   :  { %1786 = vrot.lane.b32.xlu1 %v3584_v48, %s3817_s4 }
 0xe25   :  { %1451 = vrot.lane.b32.xlu0 %v3578_v47, %s3817_s4 }
 0xe41   :  { %1948 = vadd.xlane.f32.xlu1 %v1947_v20 }
 0xe52   :  { %1952 = vrot.lane.b32.xlu1 %v3584_v48, %s3242_s26  ;;  %v2703_v48 = vld [vmem:[%s3788_s5 + $0x20] sm:$0xff] }
 0xe53   :  { %v3095_v50 = vpack.c.bf16 %v2704_v49, %v2703_v48  ;;  %v2730_v48 = vld [vmem:[%s3794_s11 + $0x78] sm:$0xff] }
 0xe55   :  { %3096 = vmatprep.subr.bf16.mxu0 %v3095_v50 }
 0xe56   :  { %3098 = vmatpush3.bf16.msra.mxu0 %v3095_v50  ;;  %v2720_v50 = vld [vmem:[%s3793_s10 + $0x1] ss:$0 sm:$0xff] }
 0xe57   :  { %3100 = vmatprep.subr.bf16.mxu0 %v3099_v53 }
 0xe5a   :  { %3102 = vmatpush3.bf16.msra.mxu0 %v3099_v53 }
 0xe94   :  { %v1448_v21 = vpop.xlane.xlu0 %1447 }
 0xe95   :  { %3191 = vrcp.f32 %v1448_v21  ;;  %v1614_v22 = vpop.xlane.xlu1 %1613 }
 0xe96   :  { %3193 = vrcp.f32 %v1614_v22 }
 0xe99   :  { %v1618_v26 = vpop.permute.xlu1 %1617 }
 0xe9c   :  { %v1783_v23 = vpop.xlane.xlu0 %1782 }
 0xe9d   :  { %3195 = vrcp.f32 %v1783_v23  ;;  %v1787_v30 = vpop.permute.xlu1 %1786 }
 0xe9f   :  { %v3192_v24 = vpop.eup %3191 }
 0xea0   :  { %v1450_v25 = vmul.f32 %v3192_v24, %v3184_v10  ;;  %v1452_v27 = vpop.permute.xlu0 %1451  ;;  %v3194_v28 = vpop.eup %3193  ;;  %v2713_v24 = vld [vmem:[%s3790_s7 + $0x1] ss:$0 sm:$0xff] }
 0xea1   :  { %2950 = vmatpush3.msra.mxu1 %v1452_v27  ;;  %v1616_v29 = vmul.f32 %v3194_v28, %v3186_v11 }
 0xea2   :  { %2952 = vmatmul.mubr.msk.f32.vlgmr.msra.gmra.mrb[16].mxu1 %vm281_vm3, %v1450_v25  ;;  %2959 = vmatprep.subr.mxu1 %v3237_v36 }
 0xea3   :  { %2960 = vmatpush3.msra.mxu1 %v1618_v26  ;;  %2961 = vmatprep.mubr.msk.f32.mxu1 %vm3238_vm1, %v3237_v36  ;;  %v2714_v26 = vld [vmem:[%s3791_s8 + $0x1] ss:$0 sm:$0xff] }
 0xea4   :  { %2969 = vmatprep.subr.mxu1 %v3237_v36 }
 0xea6   :  { %2962 = vmatmul.mubr.msk.f32.vlgmr.msra.gmra.mrb[18].mxu1 %vm281_vm3, %v1616_v29 }
 0xea7   :  { %v3196_v31 = vpop.eup %3195  ;;  %2970 = vmatpush3.msra.mxu1 %v1787_v30  ;;  %2971 = vmatprep.mubr.msk.f32.mxu1 %vm3238_vm1, %v3237_v36 }
 0xea8   :  { %v1785_v32 = vmul.f32 %v3196_v31, %v3188_v14  ;;  %2979 = vmatprep.subr.mxu1 %v3237_v36  ;;  %v2717_v14 = vld [vmem:[%s3792_s9 + $0x30] sm:$0xff] }
 0xea9   :  { %v3107_v16 = vpack.c.bf16 %v2718_v15, %v2717_v14 }
 0xeaa   :  { %2972 = vmatmul.mubr.msk.f32.vlgmr.msra.gmra.mrb[20].mxu1 %vm281_vm3, %v1785_v32 }
 0xeab   :  { %2981 = vmatprep.mubr.msk.f32.mxu1 %vm3238_vm1, %v3237_v36 }
 0xece   :  { %v1949_v34 = vpop.xlane.xlu1 %1948 }
 0xecf   :  { %3197 = vrcp.f32 %v1949_v34  ;;  %v2723_v34 = vld [vmem:[%s3794_s11 + $0x40] sm:$0xff] }
 0xed2   :  { %v1953_v37 = vpop.permute.xlu1 %1952 }
 0xed3   :  { %2980 = vmatpush3.msra.mxu1 %v1953_v37  ;;  %v2724_v37 = vld [vmem:[%s3794_s11 + $0x48] sm:$0xff] }
 0xed9   :  { %v3198_v38 = vpop.eup %3197 }
 0xeda   :  { %v1951_v39 = vmul.f32 %v3198_v38, %v3190_v19  ;;  %v3111_v38 = vpack.c.bf16 %v2724_v37, %v2723_v34 }
 0xedc   :  { %2982 = vmatmul.mubr.msk.f32.vlgmr.msra.gmra.mrb[22].mxu1 %vm281_vm3, %v1951_v39  ;;  %v2725_v39 = vld [vmem:[%s3794_s11 + $0x50] sm:$0xff]  ;;  %3112 = vmatprep.subr.bf16.mxu0 %v3111_v38 }
 0xf75   :  { %v1523_v40 = vpop.f32.mrb[16].mxu1 }
 0xf76   :  { %1527 = vst.msk [vmem:[#allocation2] sm:$0xff] %vm206_vm2, %v1523_v40  ;;  %v2953_v41 = vpop.f32.mrb[17].mxu1  ;;  %v2726_v40 = vld [vmem:[%s3794_s11 + $0x58] sm:$0xff] }
 0xf77   :  { %v3115_v41 = vpack.c.bf16 %v2726_v40, %v2725_v39 }
 0xf79   :  { %v1689_v44 = vpop.f32.mrb[18].mxu1 }
 0xf7a   :  { %1694 = vrot.lane.b32.xlu0 %v1689_v44, %s3818_s24  ;;  %v2963_v45 = vpop.f32.mrb[19].mxu1  ;;  %v2727_v44 = vld [vmem:[%s3794_s11 + $0x60] sm:$0xff] }
 0xf7b   :  { %v2728_v45 = vld [vmem:[%s3794_s11 + $0x68] sm:$0xff] }
 0xf7d   :  { %v1858_v46 = vpop.f32.mrb[20].mxu1 }
 0xf7e   :  { %1862 = vst.msk [vmem:[#allocation2 + $0x8] sm:$0xff] %vm206_vm2, %v1858_v46  ;;  %v2973_v47 = vpop.f32.mrb[21].mxu1  ;;  %v3119_v46 = vpack.c.bf16 %v2728_v45, %v2727_v44 }
 0xf7f   :  { %v2729_v47 = vld [vmem:[%s3794_s11 + $0x70] sm:$0xff] }
 0xf80   :  { %v3123_v49 = vpack.c.bf16 %v2730_v48, %v2729_v47  ;;  %v2738_v47 = vld [vmem:[%s3797_s14 + $0x1] ss:$0 sm:$0xff] }
 0xfaf   :  { %v2024_v54 = vpop.f32.mrb[22].mxu1 }
 0xfb0   :  { %2029 = vrot.lane.b32.xlu1 %v2024_v54, %s3818_s24  ;;  %v2983_v55 = vpop.f32.mrb[23].mxu1 }
 0xfec   :  { %v1695_v56 = vpop.permute.xlu0 %1694 }
 0xfed   :  { %1697 = vst.msk [vmem:[#allocation2] sm:$0xff] %vm539_vm4, %v1695_v56 }
 0xff4   :  { %v2033_v57 = vld [vmem:[#allocation2] sm:$0xff] }
 0xff5   :  { %2992 = vmatprep.mubr.msk.f32.mxu0 %vm67_vm0, %v2033_v57 }
0x1022   :  { %v2030_v58 = vpop.permute.xlu1 %2029 }
0x1023   :  { %2032 = vst.msk [vmem:[#allocation2 + $0x8] sm:$0xff] %vm539_vm4, %v2030_v58 }
0x102a   :  { %v2034_v59 = vld [vmem:[#allocation2 + $0x8] sm:$0xff] }
0x102b   :  { %2993 = vmatmul.mubr.msk.f32.vlgmr.msra.gmra.mrb[18].mxu0 %vm67_vm0, %v2034_v59 }
0x102c   :  { %3114 = vmatpush3.bf16.msra.mxu0 %v3111_v38 }
0x102d   :  { %3116 = vmatprep.subr.bf16.mxu0 %v3115_v41 }
0x1030   :  { %3118 = vmatpush3.bf16.msra.mxu0 %v3115_v41  ;;  %v2737_v41 = vld [vmem:[%s3796_s13 + $0x1] ss:$0 sm:$0xff] }
0x1031   :  { %3120 = vmatprep.subr.bf16.mxu0 %v3119_v46 }
0x1034   :  { %3122 = vmatpush3.bf16.msra.mxu0 %v3119_v46 }
0x1035   :  { %3124 = vmatprep.subr.bf16.mxu0 %v3123_v49 }
0x1038   :  { %3126 = vmatpush3.bf16.msra.mxu0 %v3123_v49 }
0x10fe   :  { %v2994_v61 = vpop.f32.mrb[18].mxu0 }
0x10ff   :  { %v2126_v62 = vadd.f32 %v2994_v61, %v2708_v60  ;;  %v2120_v63 = vpop.f32.mrb[19].mxu0 }
0x1100   :  { %v2121_v0 = vadd.f32 %v2708_v60, %v2120_v63 }
0x1101   :  { %v2130_v1 = vadd.f32 %v2126_v62, %v3567_v43 }
0x1102   :  { %v2129_v2 = vadd.f32 %v2121_v0, %v3565_v42  ;;  %v2715_v42 = vld [vmem:[%s3792_s9 + $0x20] sm:$0xff] }
0x1103   :  { %v2138_v3 = vsel %vm67_vm0, %v2130_v1, 0.0  ;;  %v3103_v13 = vpack.c.bf16 %v2716_v12, %v2715_v42 }
0x1104   :  { %2139 = vadd.xlane.f32.xlu1 %v2138_v3  ;;  %v2135_v4 = vsel %vm67_vm0, %v2129_v2, 0.0 }
0x1105   :  { %2136 = vadd.xlane.f32.xlu0 %v2135_v4  ;;  %3104 = vmatprep.subr.bf16.mxu1 %v3103_v13 }
0x1106   :  { %3106 = vmatpush3.bf16.msra.mxu1 %v3103_v13 }
0x1107   :  { %3108 = vmatprep.subr.bf16.mxu1 %v3107_v16 }
0x110a   :  { %3110 = vmatpush3.bf16.msra.mxu1 %v3107_v16 }
0x1191   :  { %v2140_v5 = vpop.xlane.xlu1 %2139 }
0x1192   :  { %v2142_v6 = vmul.f32 0.03125, %v2140_v5  ;;  %v2137_v35 = vpop.xlane.xlu0 %2136 }
0x1193   :  { %v2141_v33 = vmul.f32 0.03125, %v2137_v35 }
0x1194   :  { %v2144_v7 = vsub.f32 %v2130_v1, %v2142_v6 }
0x1195   :  { %v2143_v8 = vsub.f32 %v2129_v2, %v2141_v33 }
0x1196   :  { %v2146_v11 = vmul.f32 %v2144_v7, %v2144_v7 }
0x1197   :  { %v2145_v9 = vmul.f32 %v2143_v8, %v2143_v8 }
0x1198   :  { %v2150_v43 = vsel %vm67_vm0, %v2146_v11, 0.0 }
0x1199   :  { %v2147_v10 = vsel %vm67_vm0, %v2145_v9, 0.0 }
0x119a   :  { %2148 = vadd.xlane.f32.xlu0 %v2147_v10 }
0x119e   :  { %2151 = vadd.xlane.f32.xlu0 %v2150_v43 }
0x1227   :  { %v2149_v17 = vpop.xlane.xlu0 %2148 }
0x1228   :  { %v2153_v18 = vmul.f32 0.03125, %v2149_v17 }
0x122a   :  { %v2155_v19 = vadd.f32 1e-12, %v2153_v18 }
0x122b   :  { %v2152_v20 = vpop.xlane.xlu0 %2151 }
0x122c   :  { %3199 = vrsqrt.f32 %v2155_v19  ;;  %v2154_v21 = vmul.f32 0.03125, %v2152_v20 }
0x122e   :  { %v2156_v22 = vadd.f32 1e-12, %v2154_v21 }
0x1230   :  { %3201 = vrsqrt.f32 %v2156_v22 }
0x1236   :  { %v3200_v23 = vpop.eup %3199 }
0x1237   :  { %v2159_v25 = vmul.f32 %v3200_v23, %v2143_v8 }
0x1239   :  { %v2167_v27 = vmul.f32 %v2713_v24, %v2159_v25  ;;  %v2441_v25 = vld [vmem:[%s3798_s15 + $0x8] sm:$0xff] }
0x123a   :  { %v3202_v28 = vpop.eup %3201 }
0x123b   :  { %v2160_v29 = vmul.f32 %v3202_v28, %v2144_v7  ;;  %v2175_v30 = vadd.f32 %v2714_v26, %v2167_v27  ;;  %v2732_v7 = vld [vmem:[%s3795_s12 + $0x1] ss:$0 sm:$0xff]  ;;  %v2442_v27 = vld [vmem:[%s3798_s15 + $0x10] sm:$0xff]  ;;  %v2443_v28 = vld [vmem:[%s3798_s15 + $0x18] sm:$0xff] }
0x123d   :  { %v2168_v31 = vmul.f32 %v2713_v24, %v2160_v29  ;;  %3003 = vmatprep.mubr.msk.f32.mxu1 %vm67_vm0, %v2175_v30  ;;  %v2440_v24 = vld [vmem:[%s3798_s15] sm:$0xff]  ;;  %v3245_v29 = vmov 0.0|0.0  }
0x123e   :  { %3127 = vmatprep.subr.bf16.mxu1 %v3245_v29 }
0x123f   :  { %v2176_v32 = vadd.f32 %v2714_v26, %v2168_v31  ;;  %v3128_v26 = vpack.c.bf16 %v2441_v25, %v2440_v24 }
0x1241   :  { %3004 = vmatmul.mubr.msk.f32.vlgmr.msra.gmra.mrb[24].mxu1 %vm67_vm0, %v2176_v32 }
0x1242   :  { %3033 = vmatprep.mubr.msk.f32.mxu1 %vm3238_vm1, %v3237_v36  ;;  %3129 = vmatpush3.bf16.msra.mxu1 %v3128_v26 }
0x1243   :  { %3130 = vmatprep.subr.bf16.mxu1 %v3245_v29 }
0x1314   :  { %v3005_v51 = vpop.f32.mrb[24].mxu1 }
0x1315   :  { %v2268_v52 = vadd.f32 %v3005_v51, %v2720_v50  ;;  %v2262_v53 = vpop.f32.mrb[25].mxu1 }
0x1316   :  { %v2263_v54 = vadd.f32 %v2720_v50, %v2262_v53 }
0x1317   :  { %v2274_v55 = vmul.f32 0.044715, %v2268_v52  ;;  %v2272_v6 = vmul.f32 0.5, %v2268_v52 }
0x1318   :  { %v2273_v56 = vmul.f32 0.044715, %v2263_v54  ;;  %v2271_v4 = vmul.f32 0.5, %v2263_v54 }
0x1319   :  { %v2276_v57 = vmul.f32 %v2274_v55, %v2268_v52  ;;  %v2526_v55 = vld [vmem:[%s3800_s17 + $0x8] sm:$0xff] }
0x131a   :  { %v2275_v58 = vmul.f32 %v2273_v56, %v2263_v54  ;;  %v2527_v56 = vld [vmem:[%s3800_s17 + $0x10] sm:$0xff] }
0x131b   :  { %v2278_v59 = vmul.f32 %v2276_v57, %v2268_v52 }
0x131c   :  { %v2277_v60 = vmul.f32 %v2275_v58, %v2263_v54  ;;  %v2528_v58 = vld [vmem:[%s3800_s17 + $0x18] sm:$0xff] }
0x131d   :  { %v2280_v61 = vadd.f32 %v2278_v59, %v2268_v52  ;;  %v3137_v59 = vpack.c.bf16 %v2528_v58, %v2527_v56 }
0x131e   :  { %v2279_v62 = vadd.f32 %v2277_v60, %v2263_v54  ;;  %v2525_v54 = vld [vmem:[%s3800_s17] sm:$0xff] }
0x131f   :  { %v2282_v63 = vmul.f32 0.7978846, %v2280_v61  ;;  %v3134_v57 = vpack.c.bf16 %v2526_v55, %v2525_v54 }
0x1320   :  { %v2281_v0 = vmul.f32 0.7978846, %v2279_v62 }
0x1321   :  { %3203 = vtanh.f32 %v2282_v63 }
0x1322   :  { %3205 = vtanh.f32 %v2281_v0  ;;  %v3246_v0 = vmov 1966171168  }
0x132b   :  { %v3204_v1 = vpop.eup %3203 }
0x132c   :  { %v3206_v2 = vpop.eup %3205  ;;  %v2286_v3 = vadd.f32 1.0, %v3204_v1  ;;  %v2611_v1 = vunpack.c.l.s4 %v3246_v0 }
0x132d   :  { %v2285_v5 = vadd.f32 1.0, %v3206_v2  ;;  %v2613_v2 = vlaneseq }
0x132e   :  { %v2288_v33 = vmul.f32 %v2286_v3, %v2272_v6  ;;  %v2612_v3 = vunpack.c.0.s8 %v2611_v1 }
0x132f   :  { %v2287_v35 = vmul.f32 %v2285_v5, %v2271_v4  ;;  %v2614_v4 = vshrl.u32 %v2613_v2, 7  ;;  %v2741_v5 = vld [vmem:[%s3801_s18] ss:$0 sm:$0xff] }
0x1331   :  { %3022 = vmatprep.mubr.msk.f32.mxu0 %vm1141_vm5, %v2287_v35  ;;  %v2615_v6 = vsub.s32 %v2612_v3, %v2614_v4 }
0x1332   :  { %3023 = vmatmul.mubr.msk.f32.vlgmr.msra.gmra.mrb[20].mxu0 %vm1141_vm5, %v2288_v33 }
0x1405   :  { %v3024_v8 = vpop.f32.mrb[20].mxu0 }
0x1406   :  { %v2384_v9 = vadd.f32 %v3024_v8, %v2732_v7  ;;  %v2378_v10 = vpop.f32.mrb[21].mxu0 }
0x1407   :  { %v2379_v11 = vadd.f32 %v2732_v7, %v2378_v10 }
0x1408   :  { %v2388_v43 = vadd.f32 %v2384_v9, %v2176_v32 }
0x1409   :  { %v2387_v42 = vadd.f32 %v2379_v11, %v2175_v30  ;;  %v3131_v30 = vpack.c.bf16 %v2443_v28, %v2442_v27 }
0x140a   :  { %v2396_v12 = vsel %vm67_vm0, %v2388_v43, 0.0 }
0x140b   :  { %2397 = vadd.xlane.f32.xlu0 %v2396_v12  ;;  %v2393_v13 = vsel %vm67_vm0, %v2387_v42, 0.0  ;;  %3132 = vmatpush3.bf16.msra.mxu1 %v3131_v30 }
0x140c   :  { %2394 = vadd.xlane.f32.xlu1 %v2393_v13  ;;  %3133 = vmatprep.subr.bf16.mxu1 %v3245_v29 }
0x1498   :  { %v2398_v14 = vpop.xlane.xlu0 %2397 }
0x1499   :  { %v2400_v15 = vmul.f32 0.03125, %v2398_v14  ;;  %v2395_v16 = vpop.xlane.xlu1 %2394 }
0x149a   :  { %v2399_v17 = vmul.f32 0.03125, %v2395_v16 }
0x149b   :  { %v2402_v18 = vsub.f32 %v2388_v43, %v2400_v15 }
0x149c   :  { %v2401_v19 = vsub.f32 %v2387_v42, %v2399_v17 }
0x149d   :  { %v2404_v20 = vmul.f32 %v2402_v18, %v2402_v18 }
0x149e   :  { %v2403_v21 = vmul.f32 %v2401_v19, %v2401_v19 }
0x149f   :  { %v2408_v22 = vsel %vm67_vm0, %v2404_v20, 0.0 }
0x14a0   :  { %2409 = vadd.xlane.f32.xlu0 %v2408_v22  ;;  %v2405_v23 = vsel %vm67_vm0, %v2403_v21, 0.0 }
0x14a1   :  { %2406 = vadd.xlane.f32.xlu1 %v2405_v23 }
0x152d   :  { %v2410_v31 = vpop.xlane.xlu0 %2409 }
0x152e   :  { %v2412_v32 = vmul.f32 0.03125, %v2410_v31  ;;  %v2407_v34 = vpop.xlane.xlu1 %2406 }
0x152f   :  { %v2411_v37 = vmul.f32 0.03125, %v2407_v34 }
0x1530   :  { %v2414_v38 = vadd.f32 1e-12, %v2412_v32 }
0x1531   :  { %v2413_v39 = vadd.f32 1e-12, %v2411_v37 }
0x1532   :  { %3207 = vrsqrt.f32 %v2414_v38 }
0x1533   :  { %3209 = vrsqrt.f32 %v2413_v39 }
0x153c   :  { %v3208_v40 = vpop.eup %3207 }
0x153d   :  { %v3210_v44 = vpop.eup %3209  ;;  %v2418_v45 = vmul.f32 %v3208_v40, %v2402_v18 }
0x153e   :  { %v2417_v46 = vmul.f32 %v3210_v44, %v2401_v19 }
0x153f   :  { %v2426_v48 = vmul.f32 %v2737_v41, %v2418_v45 }
0x1540   :  { %v2425_v49 = vmul.f32 %v2737_v41, %v2417_v46 }
0x1541   :  { %v2434_v50 = vadd.f32 %v2738_v47, %v2426_v48 }
0x1542   :  { %v2433_v51 = vadd.f32 %v2738_v47, %v2425_v49 }
0x1543   :  { %v2436_v52 = vrot.slane %v2434_v50, 7 }
0x1545   :  { %v2439_v53 = vsel %vm2438_vm6, %v2433_v51, %v2436_v52 }
0x1546   :  { %3034 = vmatmul.mubr.msk.f32.vlgmr.msra.gmra.mrb[26].mxu1 %vm67_vm0, %v2439_v53 }
0x1547   :  { %3044 = vmatprep.mubr.msk.f32.mxu1 %vm3238_vm1, %v3237_v36  ;;  %3135 = vmatpush3.bf16.msra.mxu1 %v3134_v57  ;;  %v2739_v36 = vld [vmem:[%s3799_s16] ss:$0 sm:$0xff]  ;;  %s3247_s16 = smov [#allocation3]  }
0x1548   :  { %3136 = vmatprep.subr.bf16.mxu1 %v3245_v29  ;;  %s2642_s26 = sshll.u32 %s3247_s16, 4  ;;  %s2643_s26 = int_to_ptr.vmem [resolvable:$true] %s2642_s26 }
0x1549   :  { %s3213_s10 = scalar_lea.vmem %s2643_s26, 32  ;;  %p3218_p1 = scmp.lt.s32.totalorder %s2643_s26, %s2643_s26 }
0x154a   :  { %p3214_p0 = scmp.ne.s32.totalorder %s2643_s26, %s3213_s10  ;;  %p3219_p2 = scmp.lt.s32.totalorder %s3213_s10, %s3213_s10 }
0x154b   :  { %3138 = vmatpush3.bf16.msra.mxu1 %v3137_v59 }
0x154c   :  { %p3220_p3 = por %p3219_p2, %p3218_p1 }
0x154e   :  { %p3221_p4 = pnand %p3220_p3, %p3214_p0 }
0x1619   :  { %v2520_v60 = vpop.f32.mrb[26].mxu1 }
0x161a   :  { %v2521_v61 = vadd.f32 %v2739_v36, %v2520_v60  ;;  %v3035_v62 = vpop.f32.mrb[27].mxu1 }
0x161c   :  { %3211 = vtanh.f32 %v2521_v61 }
0x1626   :  { %v3212_v63 = vpop.eup %3211 }
0x1627   :  { %3045 = vmatmul.mubr.msk.f32.vlgmr.msra.gmra.mrb[28].mxu1 %vm67_vm0, %v3212_v63 }
0x16fa   :  { %v2605_v35 = vpop.f32.mrb[28].mxu1 }
0x16fb   :  { %v2606_v33 = vadd.f32 %v2741_v5, %v2605_v35  ;;  %v3046_v7 = vpop.f32.mrb[29].mxu1 }
0x16fd   :  { %v2616_v8 = vrot.slane %v2606_v33, %v2615_v6 }
0x16ff   :  { %v2617_v9 = vcombine.high %v2616_v8, %v2616_v8  ;;  %v2624_v10 = vrot.slane %v2616_v8, %v2615_v6 }
0x1701   :  { %v2631_v11 = vrot.slane %v2617_v9, %v2615_v6  ;;  %2635 = vst.msk [vmem:[#allocation3] sm:$0x1] %vm2634_vm7, %v2624_v10 }
0x1703   :  { %2636 = vst.msk [vmem:[#allocation3 + $0x1] sm:$0x1] %vm2634_vm7, %v2631_v11 }
0x1704   :  { %3224 = shalt.err (!%p3221_p4)
}
0x1705   :  { %s3225_s12 = scalar_lea.hbm %s3802_s19, 32 }
0x1706   :  { %p3226_p5 = scmp.ne.s32.totalorder %s3802_s19, %s3225_s12  ;;  %p3229_p6 = scmp.lt.u32.totalorder %s3225_s12, %s3802_s19 }
0x1708   :  { %p3231_p7 = pnand %p3229_p6, %p3226_p5 }
0x170a   :  { %3234 = shalt.err (!%p3231_p7)
}
0x170b   :  { %s3248_s20 = smov 1  }
0x170c   :  { %2648 = dma.vmem_to_hbm [thread:$0]  %s2643_s26, 32, %s3802_s19, [#allocation4], %s3818_s24, %s3818_s24, %s3248_s20  }
0x170d   :  { %3235 = dma.done.wait [#allocation4], 32  }
0x170e   :  { %3236 = vsyncadd [#allocation4], 4294967264 }
0x170f   :  { %2652 = vsyncpa [#allocation4], 1 }

</bundles_post_ra>
